<compile_context>
chip_gen: v7x
topology: tpu7x:2x2x1
jax: 0.10.0
libtpu: 0.0.40
codegen_flags: <defaults>
</compile_context>

<pallas_src>
import functools
import math

import jax
import jax.numpy as jnp
from jax.experimental import pallas as pl
from jax.experimental.pallas import tpu as pltpu

NEG_INF = float(jnp.finfo(jnp.float32).min)   # torch.finfo(float32).min, as in DistilBERT
LN_EPS = 1e-12                                # DistilBERT LayerNorm eps
LANE = 128                                    # TPU lane width


# ----------------------------- in-kernel helpers -----------------------------

def _gelu_tanh(x):
    # tanh-based GELU: transcendental goes to the EUP slot instead of a VALU
    # erf polynomial.  |diff| vs exact erf-GELU <= ~1e-3 (inference-safe).
    c = math.sqrt(2.0 / math.pi)
    return 0.5 * x * (1.0 + jnp.tanh(c * (x + 0.044715 * (x * x * x))))


def _layernorm(x, g, b):
    # statistics kept in f32
    mu = jnp.mean(x, axis=-1, keepdims=True)
    var = jnp.mean(jnp.square(x - mu), axis=-1, keepdims=True)
    return (x - mu) * jax.lax.rsqrt(var + LN_EPS) * g + b


# ------------------------------ Pallas kernel --------------------------------

def transformer_layer_kernel(n_heads, tq, exp_in_bf16, with_classifier,
                             x_ref, bias_ref,
                             wqkv, bqkv, ow, ob,
                             ln1g, ln1b, w1, b1, w2, b2, ln2g, ln2b,
                             *rest):
    """One DistilBERT TransformerBlock for one batch element, optionally fused
    with the per-position classifier head (used for the last layer).

    Attention and FFN are processed per query tile so per-tile intermediates
    stay bounded to (H, tq, S) / (tq, hidden) regardless of sequence length."""
    if with_classifier:
        cls_w, cls_b, out_ref, q_sc = rest
    else:
        out_ref, q_sc = rest

    x = x_ref[0]                                   # (S, D) bf16
    S, D = x.shape
    H = n_heads
    dh = D // H
    n_tiles = S // tq

    bias = bias_ref[0]                             # (1, S) additive mask (0 / -big), f32

    # ---- fused QKV projection: one (S, D) @ (D, 3D) bf16 MXU matmul ----
    # (1/sqrt(dh) already folded into the Q columns / bias at init)
    qkv = jnp.dot(x, wqkv[...], preferred_element_type=jnp.float32) + bqkv[...]

    # ---- head-major Q/K/V: one reshape + transpose each (no per-head stack) ----
    k_h = jnp.transpose(qkv[:, 1 * D:2 * D].astype(jnp.bfloat16).reshape(S, H, dh),
                        (1, 0, 2))                 # (H, S, dh)
    v_h = jnp.transpose(qkv[:, 2 * D:3 * D].astype(jnp.bfloat16).reshape(S, H, dh),
                        (1, 0, 2))                 # (H, S, dh)
    # Q goes to a VMEM scratch so query tiles are sliced from a ref in the loop.
    q_sc[...] = jnp.transpose(qkv[:, 0 * D:1 * D].astype(jnp.bfloat16).reshape(S, H, dh),
                              (1, 0, 2))           # (H, S, dh)

    def q_tile(t, carry):
        start = pl.multiple_of(t * tq, tq)
        qs = pl.ds(start, tq)

        # ---- attention for this query tile: intermediates are (H, tq, S) ----
        q_h = q_sc[:, qs, :]                                        # (H, tq, dh) bf16
        s = jnp.einsum('hqd,hkd->hqk', q_h, k_h,
                       preferred_element_type=jnp.float32)          # (H, tq, S)
        s = s + bias                                                # additive key mask
        m = jnp.max(s, axis=-1, keepdims=True)
        z = s - m
        if exp_in_bf16:
            # v6e/v7x EUP bf16 path (~2x transcendental throughput)
            e = jnp.exp(z.astype(jnp.bfloat16)).astype(jnp.float32)
        else:
            e = jnp.exp(z)
        denom = jnp.sum(e, axis=-1, keepdims=True)
        # divide -> EUP reciprocal (use approx=False for bit-level parity)
        p = (e * pl.reciprocal(denom, approx=True)).astype(jnp.bfloat16)
        ctx_h = jnp.einsum('hqk,hkd->hqd', p, v_h,
                           preferred_element_type=jnp.float32)      # (H, tq, dh)
        ctx = jnp.transpose(ctx_h, (1, 0, 2)).reshape(tq, D).astype(jnp.bfloat16)

        # ---- output projection + residual + sa_layer_norm ----
        attn = jnp.dot(ctx, ow[...], preferred_element_type=jnp.float32) + ob[...]
        x_t = x_ref[0, qs, :].astype(jnp.float32)
        h1 = _layernorm(attn + x_t, ln1g[...], ln1b[...])

        # ---- FFN (same query tile -> (tq, hidden) intermediate) ----
        ff = _gelu_tanh(jnp.dot(h1.astype(jnp.bfloat16), w1[...],
                                preferred_element_type=jnp.float32) + b1[...])
        ff2 = jnp.dot(ff.astype(jnp.bfloat16), w2[...],
                      preferred_element_type=jnp.float32) + b2[...]
        h2 = _layernorm(ff2 + h1, ln2g[...], ln2b[...])

        if with_classifier:
            # fused per-position classifier; lane-dense padded output, f32
            out_ref[0, qs, :] = (jnp.dot(h2.astype(jnp.bfloat16), cls_w[...],
                                         preferred_element_type=jnp.float32) + cls_b[...])
        else:
            out_ref[0, qs, :] = h2.astype(out_ref.dtype)   # bf16 inter-layer activations
        return carry

    jax.lax.fori_loop(0, n_tiles, q_tile, 0, unroll=n_tiles <= 4)


# ------------------------------ wrappers ---------------------------------------

_LAYER_WNAMES = ["wqkv", "bqkv", "ow", "ob", "ln1g", "ln1b",
                 "w1", "b1", "w2", "b2", "ln2g", "ln2b"]


def _vmem_limit_bytes():
    # generation aware: ~96 MiB on v5e/v6e (128 MiB physical), ~48 MiB on v7x (64 MiB)
    try:
        return int(0.75 * pltpu.get_tpu_info().vmem_capacity_bytes)
    except Exception:
        return 48 * 1024 * 1024


def _exp_in_bf16():
    # v6e/v7x EUP has a bf16 transcendental path; v5e does not
    try:
        kind = jax.devices()[0].device_kind.lower()
    except Exception:
        return False
    return ("v6" in kind) or ("v7" in kind)


def _pick_query_tile(S):
    for cand in (256, 128, 64, 32, 16, 8):
        if S % cand == 0:
            return cand
    return S


def run_layer(x, bias3, layer_params, n_heads, exp_bf16, cls_w=None, cls_b=None):
    """One encoder layer; if cls_w/cls_b are given, the classifier head is fused
    in and the (lane-dense, padded) f32 logits are returned instead of bf16 hidden."""
    B, S, D = x.shape
    hidden = layer_params["w1"].shape[1]
    with_classifier = cls_w is not None
    dh = D // n_heads
    tq = _pick_query_tile(S)

    ws = [layer_params[n] for n in _LAYER_WNAMES]
    if with_classifier:
        ws = ws + [cls_w, cls_b]
        out_dim = cls_w.shape[1]
        out_dtype = jnp.float32
    else:
        out_dim = D
        out_dtype = jnp.bfloat16   # bf16 inter-layer activations (halve HBM traffic)

    # advisory cost estimate for the XLA scheduler
    H = n_heads
    flops = B * (8 * S * D * D + 4 * S * S * D + 4 * S * D * hidden
                 + (2 * S * D * out_dim if with_classifier else 0))
    transcendentals = B * (H * S * S + H * S + S * hidden + 2 * S)
    bytes_accessed = (int(x.size) * x.dtype.itemsize + int(bias3.size) * 4
                      + B * S * out_dim * jnp.dtype(out_dtype).itemsize
                      + sum(int(w.size) * w.dtype.itemsize for w in ws))

    def build(single_buffer_weights):
        def weight_spec(a):
            # fully resident, constant-index weight block; Buffered(1) drops the
            # dead second pipeline buffer (index map never changes).
            nd = a.ndim
            kwargs = {}
            if single_buffer_weights:
                kwargs["pipeline_mode"] = pl.Buffered(1)
            return pl.BlockSpec(a.shape, lambda b, _nd=nd: (0,) * _nd, **kwargs)

        return pl.pallas_call(
            functools.partial(transformer_layer_kernel, n_heads, tq, exp_bf16,
                              with_classifier),
            out_shape=jax.ShapeDtypeStruct((B, S, out_dim), out_dtype),
            grid=(B,),
            in_specs=[pl.BlockSpec((1, S, D), lambda b: (b, 0, 0)),
                      pl.BlockSpec((1, 1, S), lambda b: (b, 0, 0))]
                     + [weight_spec(w) for w in ws],
            out_specs=pl.BlockSpec((1, S, out_dim), lambda b: (b, 0, 0)),
            scratch_shapes=[pltpu.VMEM((n_heads, S, dh), jnp.bfloat16)],
            compiler_params=pltpu.CompilerParams(
                dimension_semantics=("parallel",),
                vmem_limit_bytes=_vmem_limit_bytes()),
            cost_estimate=pl.CostEstimate(flops=int(flops),
                                          transcendentals=int(transcendentals),
                                          bytes_accessed=int(bytes_accessed)),
        )

    try:
        return build(single_buffer_weights=True)(x, bias3, *ws)
    except Exception:
        # TODO(synk): fallback for jax versions without BlockSpec(pipeline_mode=...);
        # weights are double-buffered there.
        return build(single_buffer_weights=False)(x, bias3, *ws)


def transformer_forward(x, mask, params, n_heads):
    """Equivalent of Transformer.forward((x, mask)) with predict_sequence=True."""
    B, S, _ = x.shape
    # additive attention bias: 0 where attended, finfo(float32).min where masked
    bias3 = jnp.where(mask.reshape(B, 1, S) == 0, NEG_INF, 0.0).astype(jnp.float32)
    h = x.astype(jnp.bfloat16)   # bf16 inter-layer activations
    exp_bf16 = _exp_in_bf16()
    n_layers = len(params["layers"])
    # TODO(synk): dropout / attention_dropout are no-ops here (inference semantics).
    # TODO(synk): for B==1 on v7x add a second "parallel" grid axis (query tiles)
    #             so both TensorCores are used; with B>=2 batch already shards.
    # TODO(synk): overlap next-layer weight DMA across layers via a cross-call
    #             DMA future to hide weight-load latency at small batch.
    for li, layer_params in enumerate(params["layers"]):
        if li == n_layers - 1:
            # classifier fused into the last layer kernel (skips one HBM round trip)
            h = run_layer(h, bias3, layer_params, n_heads, exp_bf16,
                          cls_w=params["cls_w_pad"], cls_b=params["cls_b_pad"])
        else:
            h = run_layer(h, bias3, layer_params, n_heads, exp_bf16)
    num_classes = params["num_classes"]
    logits = h[..., :num_classes]        # strip the lane padding
    if num_classes == 1:
        logits = logits[..., 0]
    return logits


# ------------------------------ parameter init ---------------------------------

def _dense_init(key, fan_in, fan_out):
    k1, k2 = jax.random.split(key)
    lim = 1.0 / math.sqrt(fan_in)
    w = jax.random.uniform(k1, (fan_in, fan_out), jnp.float32, -lim, lim)
    b = jax.random.uniform(k2, (1, fan_out), jnp.float32, -lim, lim)
    return w, b


def init_params(key, embedding_dim, hidden_dim, n_layers, n_heads, num_classes):
    D, Hd = embedding_dim, hidden_dim
    scale = 1.0 / math.sqrt(D // n_heads)   # folded into Q columns of wqkv / bqkv
    layers = []
    for _ in range(n_layers):
        key, *ks = jax.random.split(key, 7)
        qw, qb = _dense_init(ks[0], D, D)
        kw, kb = _dense_init(ks[1], D, D)
        vw, vb = _dense_init(ks[2], D, D)
        ow, ob = _dense_init(ks[3], D, D)
        w1, b1 = _dense_init(ks[4], D, Hd)
        w2, b2 = _dense_init(ks[5], Hd, D)
        layers.append(dict(
            # matmul weights stored bf16 in HBM (MXU-native, half the DMA / VMEM);
            # biases and LayerNorm params stay f32 (added post-accumulation).
            # TODO(synk): per-generation weight quantization (int8 + per-channel
            # scales on v5e/v6e, fp8 on v7x) would halve the dominant weight DMA
            # for small-batch inference; kept bf16 here for numerical parity.
            wqkv=jnp.concatenate([qw * scale, kw, vw], axis=1).astype(jnp.bfloat16),
            bqkv=jnp.concatenate([qb * scale, kb, vb], axis=1),
            ow=ow.astype(jnp.bfloat16), ob=ob,
            ln1g=jnp.ones((1, D), jnp.float32),
            ln1b=jnp.zeros((1, D), jnp.float32),
            w1=w1.astype(jnp.bfloat16), b1=b1,
            w2=w2.astype(jnp.bfloat16), b2=b2,
            ln2g=jnp.ones((1, D), jnp.float32),
            ln2b=jnp.zeros((1, D), jnp.float32),
        ))
    key, kc = jax.random.split(key)
    cls_w, cls_b = _dense_init(kc, D, num_classes)
    # pad classifier output to a full 128-lane slab for unmasked vector stores
    c_pad = max(LANE, ((num_classes + LANE - 1) // LANE) * LANE)
    cls_w_pad = jnp.zeros((D, c_pad), jnp.float32).at[:, :num_classes].set(cls_w)
    cls_b_pad = jnp.zeros((1, c_pad), jnp.float32).at[:, :num_classes].set(cls_b[0])
    return dict(layers=layers,
                cls_w_pad=cls_w_pad.astype(jnp.bfloat16),
                cls_b_pad=cls_b_pad,
                num_classes=num_classes)


# ------------------------------------ main --------------------------------------

if __name__ == "__main__":
    B, S = 2, 8
    embedding_dim, hidden_dim = 32, 64
    n_layers, n_heads = 2, 4
    num_classes = 3

    key = jax.random.PRNGKey(0)
    key, kx, kp = jax.random.split(key, 3)

    x = jax.random.normal(kx, (B, S, embedding_dim), jnp.float32)
    mask = jnp.ones((B, S), jnp.float32)
    mask = mask.at[1, 6:].set(0.0)   # mask out last two key positions of sample 1

    params = init_params(kp, embedding_dim, hidden_dim, n_layers, n_heads, num_classes)

    out = transformer_forward(x, mask, params, n_heads)
    out = jax.block_until_ready(out)

    assert out.shape == (B, S, num_classes), out.shape
    assert bool(jnp.all(jnp.isfinite(out)))
    print("KERNEL_OK")
</pallas_src>

<mosaic_0001>
module attributes {stable_mosaic.version = 11 : i64} {
  func.func @transformer_layer_kernel(%arg0: i32, %arg1: memref<1x8x32xbf16, #tpu.memory_space<vmem>>, %arg2: memref<1x1x8xf32, #tpu.memory_space<vmem>>, %arg3: memref<32x96xbf16, #tpu.memory_space<vmem>>, %arg4: memref<1x96xf32, #tpu.memory_space<vmem>>, %arg5: memref<32x32xbf16, #tpu.memory_space<vmem>>, %arg6: memref<1x32xf32, #tpu.memory_space<vmem>>, %arg7: memref<1x32xf32, #tpu.memory_space<vmem>>, %arg8: memref<1x32xf32, #tpu.memory_space<vmem>>, %arg9: memref<32x64xbf16, #tpu.memory_space<vmem>>, %arg10: memref<1x64xf32, #tpu.memory_space<vmem>>, %arg11: memref<64x32xbf16, #tpu.memory_space<vmem>>, %arg12: memref<1x32xf32, #tpu.memory_space<vmem>>, %arg13: memref<1x32xf32, #tpu.memory_space<vmem>>, %arg14: memref<1x32xf32, #tpu.memory_space<vmem>>, %arg15: memref<1x8x32xbf16, #tpu.memory_space<vmem>>, %arg16: memref<4x8x8xbf16, #tpu.memory_space<vmem>>) attributes {dimension_semantics = [#tpu.dimension_semantics<parallel>], iteration_bounds = array<i64: 2>, scalar_prefetch = 0 : i64, scratch_operands = 1 : i64, tpu.core_type = #tpu.core_type<tc>, window_params = [{transform_indices = @transform_0, window_bounds = array<i64: 1, 8, 32>}, {transform_indices = @transform_1, window_bounds = array<i64: 1, 1, 8>}, {pipeline_mode = #tpu.pipeline_mode<synchronous>, transform_indices = @transform_2, window_bounds = array<i64: 32, 96>}, {pipeline_mode = #tpu.pipeline_mode<synchronous>, transform_indices = @transform_3, window_bounds = array<i64: 1, 96>}, {pipeline_mode = #tpu.pipeline_mode<synchronous>, transform_indices = @transform_4, window_bounds = array<i64: 32, 32>}, {pipeline_mode = #tpu.pipeline_mode<synchronous>, transform_indices = @transform_5, window_bounds = array<i64: 1, 32>}, {pipeline_mode = #tpu.pipeline_mode<synchronous>, transform_indices = @transform_6, window_bounds = array<i64: 1, 32>}, {pipeline_mode = #tpu.pipeline_mode<synchronous>, transform_indices = @transform_7, window_bounds = array<i64: 1, 32>}, {pipeline_mode = #tpu.pipeline_mode<synchronous>, transform_indices = @transform_8, window_bounds = array<i64: 32, 64>}, {pipeline_mode = #tpu.pipeline_mode<synchronous>, transform_indices = @transform_9, window_bounds = array<i64: 1, 64>}, {pipeline_mode = #tpu.pipeline_mode<synchronous>, transform_indices = @transform_10, window_bounds = array<i64: 64, 32>}, {pipeline_mode = #tpu.pipeline_mode<synchronous>, transform_indices = @transform_11, window_bounds = array<i64: 1, 32>}, {pipeline_mode = #tpu.pipeline_mode<synchronous>, transform_indices = @transform_12, window_bounds = array<i64: 1, 32>}, {pipeline_mode = #tpu.pipeline_mode<synchronous>, transform_indices = @transform_13, window_bounds = array<i64: 1, 32>}, {transform_indices = @transform_14, window_bounds = array<i64: 1, 8, 32>}]} {
    %c0 = arith.constant 0 : index
    %c0_0 = arith.constant 0 : index
    %c0_1 = arith.constant 0 : index
    %0 = vector.load %arg1[%c0, %c0_0, %c0_1] : memref<1x8x32xbf16, #tpu.memory_space<vmem>>, vector<1x8x32xbf16>
    %1 = vector.shape_cast %0 : vector<1x8x32xbf16> to vector<8x32xbf16>
    %c0_2 = arith.constant 0 : index
    %c0_3 = arith.constant 0 : index
    %c0_4 = arith.constant 0 : index
    %2 = vector.load %arg2[%c0_2, %c0_3, %c0_4] : memref<1x1x8xf32, #tpu.memory_space<vmem>>, vector<1x1x8xf32>
    %3 = vector.shape_cast %2 : vector<1x1x8xf32> to vector<1x8xf32>
    %c0_5 = arith.constant 0 : index
    %c0_6 = arith.constant 0 : index
    %4 = vector.load %arg3[%c0_5, %c0_6] : memref<32x96xbf16, #tpu.memory_space<vmem>>, vector<32x96xbf16>
    %cst = arith.constant dense<0.000000e+00> : vector<8x96xf32>
    %5 = tpu.matmul %1, %4, %cst {dimension_numbers = #tpu.dot_dimension_numbers<[1], [0], [0], [1], [0, 0, 1, 1], [], []>} : vector<8x32xbf16>, vector<32x96xbf16>, vector<8x96xf32> -> vector<8x96xf32>
    %c0_7 = arith.constant 0 : index
    %c0_8 = arith.constant 0 : index
    %6 = vector.load %arg4[%c0_7, %c0_8] : memref<1x96xf32, #tpu.memory_space<vmem>>, vector<1x96xf32>
    %7 = vector.broadcast %6 : vector<1x96xf32> to vector<8x96xf32>
    %8 = arith.addf %5, %7 : vector<8x96xf32>
    %9 = vector.extract_strided_slice %8 {offsets = [0, 32], sizes = [8, 32], strides = [1, 1]} : vector<8x96xf32> to vector<8x32xf32>
    %10 = arith.truncf %9 : vector<8x32xf32> to vector<8x32xbf16>
    %11 = vector.shape_cast %10 : vector<8x32xbf16> to vector<8x4x8xbf16>
    %12 = tpu.transpose %11, [1, 0, 2] : vector<8x4x8xbf16> -> vector<4x8x8xbf16>
    %13 = vector.extract_strided_slice %8 {offsets = [0, 64], sizes = [8, 32], strides = [1, 1]} : vector<8x96xf32> to vector<8x32xf32>
    %14 = arith.truncf %13 : vector<8x32xf32> to vector<8x32xbf16>
    %15 = vector.shape_cast %14 : vector<8x32xbf16> to vector<8x4x8xbf16>
    %16 = tpu.transpose %15, [1, 0, 2] : vector<8x4x8xbf16> -> vector<4x8x8xbf16>
    %17 = vector.extract_strided_slice %8 {offsets = [0, 0], sizes = [8, 32], strides = [1, 1]} : vector<8x96xf32> to vector<8x32xf32>
    %18 = arith.truncf %17 : vector<8x32xf32> to vector<8x32xbf16>
    %19 = vector.shape_cast %18 : vector<8x32xbf16> to vector<8x4x8xbf16>
    %20 = tpu.transpose %19, [1, 0, 2] : vector<8x4x8xbf16> -> vector<4x8x8xbf16>
    %c0_9 = arith.constant 0 : index
    %c0_10 = arith.constant 0 : index
    %c0_11 = arith.constant 0 : index
    %21 = vector.load %arg16[%c0_9, %c0_10, %c0_11] : memref<4x8x8xbf16, #tpu.memory_space<vmem>>, vector<4x8x8xbf16>
    tpu.vector_store %arg16[%c0_9, %c0_10, %c0_11], %20 {strides = array<i32>} : memref<4x8x8xbf16, #tpu.memory_space<vmem>>, vector<4x8x8xbf16>,
    %c0_i32 = arith.constant 0 : i32
    %c8_i32 = arith.constant 8 : i32
    %22 = arith.muli %c0_i32, %c8_i32 : i32
    %23 = tpu.assume_multiple %22, 8 : i32
    %c0_12 = arith.constant 0 : index
    %24 = arith.index_cast %23 : i32 to index
    %c0_13 = arith.constant 0 : index
    %25 = vector.load %arg16[%c0_12, %24, %c0_13] : memref<4x8x8xbf16, #tpu.memory_space<vmem>>, vector<4x8x8xbf16>
    "tpu.trace_start"() <{level = 10 : i32, message = "hqd,hkd->hqk"}> : () -> ()
    %cst_14 = arith.constant dense<0.000000e+00> : vector<4x8x8xf32>
    %26 = tpu.matmul %25, %12, %cst_14 {dimension_numbers = #tpu.dot_dimension_numbers<[2], [2], [1], [1], [0, 0, 0, 1, 1, 1], [0], [0]>} : vector<4x8x8xbf16>, vector<4x8x8xbf16>, vector<4x8x8xf32> -> vector<4x8x8xf32>
    "tpu.trace_stop"() : () -> ()
    %27 = vector.shape_cast %3 : vector<1x8xf32> to vector<1x1x8xf32>
    %28 = vector.broadcast %27 : vector<1x1x8xf32> to vector<4x8x8xf32>
    %29 = arith.addf %26, %28 : vector<4x8x8xf32>
    %cst_15 = arith.constant dense<0xFF800000> : vector<4x8xf32>
    %30 = vector.multi_reduction <maximumf>, %29, %cst_15 [2] : vector<4x8x8xf32> to vector<4x8xf32>
    %31 = vector.shape_cast %30 : vector<4x8xf32> to vector<4x8x1xf32>
    %32 = vector.broadcast %31 : vector<4x8x1xf32> to vector<4x8x8xf32>
    %33 = arith.subf %29, %32 : vector<4x8x8xf32>
    %34 = math.exp %33 : vector<4x8x8xf32>
    %cst_16 = arith.constant dense<0.000000e+00> : vector<4x8xf32>
    %35 = vector.multi_reduction <add>, %34, %cst_16 [2] : vector<4x8x8xf32> to vector<4x8xf32>
    %36 = vector.shape_cast %35 : vector<4x8xf32> to vector<4x8x1xf32>
    %37 = tpu.reciprocal %36 {approx = true} : vector<4x8x1xf32> -> vector<4x8x1xf32>
    %38 = vector.broadcast %37 : vector<4x8x1xf32> to vector<4x8x8xf32>
    %39 = arith.mulf %34, %38 : vector<4x8x8xf32>
    %40 = arith.truncf %39 : vector<4x8x8xf32> to vector<4x8x8xbf16>
    "tpu.trace_start"() <{level = 10 : i32, message = "hqk,hkd->hqd"}> : () -> ()
    %cst_17 = arith.constant dense<0.000000e+00> : vector<4x8x8xf32>
    %41 = tpu.matmul %40, %16, %cst_17 {dimension_numbers = #tpu.dot_dimension_numbers<[2], [1], [1], [2], [0, 0, 0, 1, 1, 2], [0], [0]>} : vector<4x8x8xbf16>, vector<4x8x8xbf16>, vector<4x8x8xf32> -> vector<4x8x8xf32>
    "tpu.trace_stop"() : () -> ()
    %42 = tpu.transpose %41, [1, 0, 2] : vector<4x8x8xf32> -> vector<8x4x8xf32>
    %43 = vector.shape_cast %42 : vector<8x4x8xf32> to vector<8x32xf32>
    %44 = arith.truncf %43 : vector<8x32xf32> to vector<8x32xbf16>
    %c0_18 = arith.constant 0 : index
    %c0_19 = arith.constant 0 : index
    %45 = vector.load %arg5[%c0_18, %c0_19] : memref<32x32xbf16, #tpu.memory_space<vmem>>, vector<32x32xbf16>
    %cst_20 = arith.constant dense<0.000000e+00> : vector<8x32xf32>
    %46 = tpu.matmul %44, %45, %cst_20 {dimension_numbers = #tpu.dot_dimension_numbers<[1], [0], [0], [1], [0, 0, 1, 1], [], []>} : vector<8x32xbf16>, vector<32x32xbf16>, vector<8x32xf32> -> vector<8x32xf32>
    %c0_21 = arith.constant 0 : index
    %c0_22 = arith.constant 0 : index
    %47 = vector.load %arg6[%c0_21, %c0_22] : memref<1x32xf32, #tpu.memory_space<vmem>>, vector<1x32xf32>
    %48 = vector.broadcast %47 : vector<1x32xf32> to vector<8x32xf32>
    %49 = arith.addf %46, %48 : vector<8x32xf32>
    %c0_23 = arith.constant 0 : index
    %50 = arith.index_cast %23 : i32 to index
    %c0_24 = arith.constant 0 : index
    %51 = vector.load %arg1[%c0_23, %50, %c0_24] : memref<1x8x32xbf16, #tpu.memory_space<vmem>>, vector<1x8x32xbf16>
    %52 = vector.shape_cast %51 : vector<1x8x32xbf16> to vector<8x32xbf16>
    %53 = arith.extf %52 : vector<8x32xbf16> to vector<8x32xf32>
    %54 = arith.addf %49, %53 : vector<8x32xf32>
    %c0_25 = arith.constant 0 : index
    %c0_26 = arith.constant 0 : index
    %55 = vector.load %arg7[%c0_25, %c0_26] : memref<1x32xf32, #tpu.memory_space<vmem>>, vector<1x32xf32>
    %c0_27 = arith.constant 0 : index
    %c0_28 = arith.constant 0 : index
    %56 = vector.load %arg8[%c0_27, %c0_28] : memref<1x32xf32, #tpu.memory_space<vmem>>, vector<1x32xf32>
    %cst_29 = arith.constant dense<0.000000e+00> : vector<8xf32>
    %57 = vector.multi_reduction <add>, %54, %cst_29 [1] : vector<8x32xf32> to vector<8xf32>
    %58 = vector.shape_cast %57 : vector<8xf32> to vector<8x1xf32>
    %cst_30 = arith.constant 3.200000e+01 : f32
    %59 = vector.broadcast %cst_30 : f32 to vector<8x1xf32>
    %60 = arith.divf %58, %59 : vector<8x1xf32>
    %61 = vector.broadcast %60 : vector<8x1xf32> to vector<8x32xf32>
    %62 = arith.subf %54, %61 : vector<8x32xf32>
    %63 = arith.mulf %62, %62 : vector<8x32xf32>
    %cst_31 = arith.constant dense<0.000000e+00> : vector<8xf32>
    %64 = vector.multi_reduction <add>, %63, %cst_31 [1] : vector<8x32xf32> to vector<8xf32>
    %65 = vector.shape_cast %64 : vector<8xf32> to vector<8x1xf32>
    %cst_32 = arith.constant 3.200000e+01 : f32
    %66 = vector.broadcast %cst_32 : f32 to vector<8x1xf32>
    %67 = arith.divf %65, %66 : vector<8x1xf32>
    %68 = vector.broadcast %60 : vector<8x1xf32> to vector<8x32xf32>
    %69 = arith.subf %54, %68 : vector<8x32xf32>
    %cst_33 = arith.constant 9.99999996E-13 : f32
    %70 = vector.broadcast %cst_33 : f32 to vector<8x1xf32>
    %71 = arith.addf %67, %70 : vector<8x1xf32>
    %72 = math.rsqrt %71 : vector<8x1xf32>
    %73 = vector.broadcast %72 : vector<8x1xf32> to vector<8x32xf32>
    %74 = arith.mulf %69, %73 : vector<8x32xf32>
    %75 = vector.broadcast %55 : vector<1x32xf32> to vector<8x32xf32>
    %76 = arith.mulf %74, %75 : vector<8x32xf32>
    %77 = vector.broadcast %56 : vector<1x32xf32> to vector<8x32xf32>
    %78 = arith.addf %76, %77 : vector<8x32xf32>
    %79 = arith.truncf %78 : vector<8x32xf32> to vector<8x32xbf16>
    %c0_34 = arith.constant 0 : index
    %c0_35 = arith.constant 0 : index
    %80 = vector.load %arg9[%c0_34, %c0_35] : memref<32x64xbf16, #tpu.memory_space<vmem>>, vector<32x64xbf16>
    %cst_36 = arith.constant dense<0.000000e+00> : vector<8x64xf32>
    %81 = tpu.matmul %79, %80, %cst_36 {dimension_numbers = #tpu.dot_dimension_numbers<[1], [0], [0], [1], [0, 0, 1, 1], [], []>} : vector<8x32xbf16>, vector<32x64xbf16>, vector<8x64xf32> -> vector<8x64xf32>
    %c0_37 = arith.constant 0 : index
    %c0_38 = arith.constant 0 : index
    %82 = vector.load %arg10[%c0_37, %c0_38] : memref<1x64xf32, #tpu.memory_space<vmem>>, vector<1x64xf32>
    %83 = vector.broadcast %82 : vector<1x64xf32> to vector<8x64xf32>
    %84 = arith.addf %81, %83 : vector<8x64xf32>
    %cst_39 = arith.constant 5.000000e-01 : f32
    %85 = vector.broadcast %cst_39 : f32 to vector<8x64xf32>
    %86 = arith.mulf %85, %84 : vector<8x64xf32>
    %87 = arith.mulf %84, %84 : vector<8x64xf32>
    %88 = arith.mulf %87, %84 : vector<8x64xf32>
    %cst_40 = arith.constant 4.471500e-02 : f32
    %89 = vector.broadcast %cst_40 : f32 to vector<8x64xf32>
    %90 = arith.mulf %89, %88 : vector<8x64xf32>
    %91 = arith.addf %84, %90 : vector<8x64xf32>
    %cst_41 = arith.constant 0.797884583 : f32
    %92 = vector.broadcast %cst_41 : f32 to vector<8x64xf32>
    %93 = arith.mulf %92, %91 : vector<8x64xf32>
    %94 = math.tanh %93 : vector<8x64xf32>
    %cst_42 = arith.constant 1.000000e+00 : f32
    %95 = vector.broadcast %cst_42 : f32 to vector<8x64xf32>
    %96 = arith.addf %95, %94 : vector<8x64xf32>
    %97 = arith.mulf %86, %96 : vector<8x64xf32>
    %98 = arith.truncf %97 : vector<8x64xf32> to vector<8x64xbf16>
    %c0_43 = arith.constant 0 : index
    %c0_44 = arith.constant 0 : index
    %99 = vector.load %arg11[%c0_43, %c0_44] : memref<64x32xbf16, #tpu.memory_space<vmem>>, vector<64x32xbf16>
    %cst_45 = arith.constant dense<0.000000e+00> : vector<8x32xf32>
    %100 = tpu.matmul %98, %99, %cst_45 {dimension_numbers = #tpu.dot_dimension_numbers<[1], [0], [0], [1], [0, 0, 1, 1], [], []>} : vector<8x64xbf16>, vector<64x32xbf16>, vector<8x32xf32> -> vector<8x32xf32>
    %c0_46 = arith.constant 0 : index
    %c0_47 = arith.constant 0 : index
    %101 = vector.load %arg12[%c0_46, %c0_47] : memref<1x32xf32, #tpu.memory_space<vmem>>, vector<1x32xf32>
    %102 = vector.broadcast %101 : vector<1x32xf32> to vector<8x32xf32>
    %103 = arith.addf %100, %102 : vector<8x32xf32>
    %104 = arith.addf %103, %78 : vector<8x32xf32>
    %c0_48 = arith.constant 0 : index
    %c0_49 = arith.constant 0 : index
    %105 = vector.load %arg13[%c0_48, %c0_49] : memref<1x32xf32, #tpu.memory_space<vmem>>, vector<1x32xf32>
    %c0_50 = arith.constant 0 : index
    %c0_51 = arith.constant 0 : index
    %106 = vector.load %arg14[%c0_50, %c0_51] : memref<1x32xf32, #tpu.memory_space<vmem>>, vector<1x32xf32>
    %cst_52 = arith.constant dense<0.000000e+00> : vector<8xf32>
    %107 = vector.multi_reduction <add>, %104, %cst_52 [1] : vector<8x32xf32> to vector<8xf32>
    %108 = vector.shape_cast %107 : vector<8xf32> to vector<8x1xf32>
    %cst_53 = arith.constant 3.200000e+01 : f32
    %109 = vector.broadcast %cst_53 : f32 to vector<8x1xf32>
    %110 = arith.divf %108, %109 : vector<8x1xf32>
    %111 = vector.broadcast %110 : vector<8x1xf32> to vector<8x32xf32>
    %112 = arith.subf %104, %111 : vector<8x32xf32>
    %113 = arith.mulf %112, %112 : vector<8x32xf32>
    %cst_54 = arith.constant dense<0.000000e+00> : vector<8xf32>
    %114 = vector.multi_reduction <add>, %113, %cst_54 [1] : vector<8x32xf32> to vector<8xf32>
    %115 = vector.shape_cast %114 : vector<8xf32> to vector<8x1xf32>
    %cst_55 = arith.constant 3.200000e+01 : f32
    %116 = vector.broadcast %cst_55 : f32 to vector<8x1xf32>
    %117 = arith.divf %115, %116 : vector<8x1xf32>
    %118 = vector.broadcast %110 : vector<8x1xf32> to vector<8x32xf32>
    %119 = arith.subf %104, %118 : vector<8x32xf32>
    %cst_56 = arith.constant 9.99999996E-13 : f32
    %120 = vector.broadcast %cst_56 : f32 to vector<8x1xf32>
    %121 = arith.addf %117, %120 : vector<8x1xf32>
    %122 = math.rsqrt %121 : vector<8x1xf32>
    %123 = vector.broadcast %122 : vector<8x1xf32> to vector<8x32xf32>
    %124 = arith.mulf %119, %123 : vector<8x32xf32>
    %125 = vector.broadcast %105 : vector<1x32xf32> to vector<8x32xf32>
    %126 = arith.mulf %124, %125 : vector<8x32xf32>
    %127 = vector.broadcast %106 : vector<1x32xf32> to vector<8x32xf32>
    %128 = arith.addf %126, %127 : vector<8x32xf32>
    %129 = arith.truncf %128 : vector<8x32xf32> to vector<8x32xbf16>
    %c0_57 = arith.constant 0 : index
    %130 = arith.index_cast %23 : i32 to index
    %c0_58 = arith.constant 0 : index
    %131 = vector.load %arg15[%c0_57, %130, %c0_58] : memref<1x8x32xbf16, #tpu.memory_space<vmem>>, vector<1x8x32xbf16>
    %132 = vector.shape_cast %131 : vector<1x8x32xbf16> to vector<8x32xbf16>
    %133 = vector.shape_cast %129 : vector<8x32xbf16> to vector<1x8x32xbf16>
    tpu.vector_store %arg15[%c0_57, %130, %c0_58], %133 {strides = array<i32>} : memref<1x8x32xbf16, #tpu.memory_space<vmem>>, vector<1x8x32xbf16>,
    %c1_i32 = arith.constant 1 : i32
    return
  }
  func.func @transform_0(%arg0: i32) -> (i32, i32, i32) {
    %c0_i32 = arith.constant 0 : i32
    %c0_i32_0 = arith.constant 0 : i32
    %c0_i32_1 = arith.constant 0 : i32
    return %arg0, %c0_i32, %c0_i32_0 : i32, i32, i32
  }
  func.func @transform_1(%arg0: i32) -> (i32, i32, i32) {
    %c0_i32 = arith.constant 0 : i32
    %c0_i32_0 = arith.constant 0 : i32
    %c0_i32_1 = arith.constant 0 : i32
    return %arg0, %c0_i32, %c0_i32_0 : i32, i32, i32
  }
  func.func @transform_2(%arg0: i32) -> (i32, i32) {
    %c0_i32 = arith.constant 0 : i32
    %c0_i32_0 = arith.constant 0 : i32
    %c0_i32_1 = arith.constant 0 : i32
    return %c0_i32, %c0_i32_0 : i32, i32
  }
  func.func @transform_3(%arg0: i32) -> (i32, i32) {
    %c0_i32 = arith.constant 0 : i32
    %c0_i32_0 = arith.constant 0 : i32
    %c0_i32_1 = arith.constant 0 : i32
    return %c0_i32, %c0_i32_0 : i32, i32
  }
  func.func @transform_4(%arg0: i32) -> (i32, i32) {
    %c0_i32 = arith.constant 0 : i32
    %c0_i32_0 = arith.constant 0 : i32
    %c0_i32_1 = arith.constant 0 : i32
    return %c0_i32, %c0_i32_0 : i32, i32
  }
  func.func @transform_5(%arg0: i32) -> (i32, i32) {
    %c0_i32 = arith.constant 0 : i32
    %c0_i32_0 = arith.constant 0 : i32
    %c0_i32_1 = arith.constant 0 : i32
    return %c0_i32, %c0_i32_0 : i32, i32
  }
  func.func @transform_6(%arg0: i32) -> (i32, i32) {
    %c0_i32 = arith.constant 0 : i32
    %c0_i32_0 = arith.constant 0 : i32
    %c0_i32_1 = arith.constant 0 : i32
    return %c0_i32, %c0_i32_0 : i32, i32
  }
  func.func @transform_7(%arg0: i32) -> (i32, i32) {
    %c0_i32 = arith.constant 0 : i32
    %c0_i32_0 = arith.constant 0 : i32
    %c0_i32_1 = arith.constant 0 : i32
    return %c0_i32, %c0_i32_0 : i32, i32
  }
  func.func @transform_8(%arg0: i32) -> (i32, i32) {
    %c0_i32 = arith.constant 0 : i32
    %c0_i32_0 = arith.constant 0 : i32
    %c0_i32_1 = arith.constant 0 : i32
    return %c0_i32, %c0_i32_0 : i32, i32
  }
  func.func @transform_9(%arg0: i32) -> (i32, i32) {
    %c0_i32 = arith.constant 0 : i32
    %c0_i32_0 = arith.constant 0 : i32
    %c0_i32_1 = arith.constant 0 : i32
    return %c0_i32, %c0_i32_0 : i32, i32
  }
  func.func @transform_10(%arg0: i32) -> (i32, i32) {
    %c0_i32 = arith.constant 0 : i32
    %c0_i32_0 = arith.constant 0 : i32
    %c0_i32_1 = arith.constant 0 : i32
    return %c0_i32, %c0_i32_0 : i32, i32
  }
  func.func @transform_11(%arg0: i32) -> (i32, i32) {
    %c0_i32 = arith.constant 0 : i32
    %c0_i32_0 = arith.constant 0 : i32
    %c0_i32_1 = arith.constant 0 : i32
    return %c0_i32, %c0_i32_0 : i32, i32
  }
  func.func @transform_12(%arg0: i32) -> (i32, i32) {
    %c0_i32 = arith.constant 0 : i32
    %c0_i32_0 = arith.constant 0 : i32
    %c0_i32_1 = arith.constant 0 : i32
    return %c0_i32, %c0_i32_0 : i32, i32
  }
  func.func @transform_13(%arg0: i32) -> (i32, i32) {
    %c0_i32 = arith.constant 0 : i32
    %c0_i32_0 = arith.constant 0 : i32
    %c0_i32_1 = arith.constant 0 : i32
    return %c0_i32, %c0_i32_0 : i32, i32
  }
  func.func @transform_14(%arg0: i32) -> (i32, i32, i32) {
    %c0_i32 = arith.constant 0 : i32
    %c0_i32_0 = arith.constant 0 : i32
    %c0_i32_1 = arith.constant 0 : i32
    return %arg0, %c0_i32, %c0_i32_0 : i32, i32, i32
  }
}

module attributes {stable_mosaic.version = 11 : i64} {
  func.func @transformer_layer_kernel(%arg0: i32, %arg1: memref<1x8x32xbf16, #tpu.memory_space<vmem>>, %arg2: memref<1x1x8xf32, #tpu.memory_space<vmem>>, %arg3: memref<32x96xbf16, #tpu.memory_space<vmem>>, %arg4: memref<1x96xf32, #tpu.memory_space<vmem>>, %arg5: memref<32x32xbf16, #tpu.memory_space<vmem>>, %arg6: memref<1x32xf32, #tpu.memory_space<vmem>>, %arg7: memref<1x32xf32, #tpu.memory_space<vmem>>, %arg8: memref<1x32xf32, #tpu.memory_space<vmem>>, %arg9: memref<32x64xbf16, #tpu.memory_space<vmem>>, %arg10: memref<1x64xf32, #tpu.memory_space<vmem>>, %arg11: memref<64x32xbf16, #tpu.memory_space<vmem>>, %arg12: memref<1x32xf32, #tpu.memory_space<vmem>>, %arg13: memref<1x32xf32, #tpu.memory_space<vmem>>, %arg14: memref<1x32xf32, #tpu.memory_space<vmem>>, %arg15: memref<1x8x32xbf16, #tpu.memory_space<vmem>>, %arg16: memref<4x8x8xbf16, #tpu.memory_space<vmem>>) attributes {dimension_semantics = [#tpu.dimension_semantics<parallel>], iteration_bounds = array<i64: 2>, scalar_prefetch = 0 : i64, scratch_operands = 1 : i64, tpu.core_type = #tpu.core_type<tc>, window_params = [{transform_indices = @transform_0, window_bounds = array<i64: 1, 8, 32>}, {transform_indices = @transform_1, window_bounds = array<i64: 1, 1, 8>}, {pipeline_mode = #tpu.pipeline_mode<synchronous>, transform_indices = @transform_2, window_bounds = array<i64: 32, 96>}, {pipeline_mode = #tpu.pipeline_mode<synchronous>, transform_indices = @transform_3, window_bounds = array<i64: 1, 96>}, {pipeline_mode = #tpu.pipeline_mode<synchronous>, transform_indices = @transform_4, window_bounds = array<i64: 32, 32>}, {pipeline_mode = #tpu.pipeline_mode<synchronous>, transform_indices = @transform_5, window_bounds = array<i64: 1, 32>}, {pipeline_mode = #tpu.pipeline_mode<synchronous>, transform_indices = @transform_6, window_bounds = array<i64: 1, 32>}, {pipeline_mode = #tpu.pipeline_mode<synchronous>, transform_indices = @transform_7, window_bounds = array<i64: 1, 32>}, {pipeline_mode = #tpu.pipeline_mode<synchronous>, transform_indices = @transform_8, window_bounds = array<i64: 32, 64>}, {pipeline_mode = #tpu.pipeline_mode<synchronous>, transform_indices = @transform_9, window_bounds = array<i64: 1, 64>}, {pipeline_mode = #tpu.pipeline_mode<synchronous>, transform_indices = @transform_10, window_bounds = array<i64: 64, 32>}, {pipeline_mode = #tpu.pipeline_mode<synchronous>, transform_indices = @transform_11, window_bounds = array<i64: 1, 32>}, {pipeline_mode = #tpu.pipeline_mode<synchronous>, transform_indices = @transform_12, window_bounds = array<i64: 1, 32>}, {pipeline_mode = #tpu.pipeline_mode<synchronous>, transform_indices = @transform_13, window_bounds = array<i64: 1, 32>}, {transform_indices = @transform_14, window_bounds = array<i64: 1, 8, 32>}]} {
    %c0 = arith.constant 0 : index
    %c0_0 = arith.constant 0 : index
    %c0_1 = arith.constant 0 : index
    %0 = vector.load %arg1[%c0, %c0_0, %c0_1] : memref<1x8x32xbf16, #tpu.memory_space<vmem>>, vector<1x8x32xbf16>
    %1 = vector.shape_cast %0 : vector<1x8x32xbf16> to vector<8x32xbf16>
    %c0_2 = arith.constant 0 : index
    %c0_3 = arith.constant 0 : index
    %c0_4 = arith.constant 0 : index
    %2 = vector.load %arg2[%c0_2, %c0_3, %c0_4] : memref<1x1x8xf32, #tpu.memory_space<vmem>>, vector<1x1x8xf32>
    %3 = vector.shape_cast %2 : vector<1x1x8xf32> to vector<1x8xf32>
    %c0_5 = arith.constant 0 : index
    %c0_6 = arith.constant 0 : index
    %4 = vector.load %arg3[%c0_5, %c0_6] : memref<32x96xbf16, #tpu.memory_space<vmem>>, vector<32x96xbf16>
    %cst = arith.constant dense<0.000000e+00> : vector<8x96xf32>
    %5 = tpu.matmul %1, %4, %cst {dimension_numbers = #tpu.dot_dimension_numbers<[1], [0], [0], [1], [0, 0, 1, 1], [], []>} : vector<8x32xbf16>, vector<32x96xbf16>, vector<8x96xf32> -> vector<8x96xf32>
    %c0_7 = arith.constant 0 : index
    %c0_8 = arith.constant 0 : index
    %6 = vector.load %arg4[%c0_7, %c0_8] : memref<1x96xf32, #tpu.memory_space<vmem>>, vector<1x96xf32>
    %7 = vector.broadcast %6 : vector<1x96xf32> to vector<8x96xf32>
    %8 = arith.addf %5, %7 : vector<8x96xf32>
    %9 = vector.extract_strided_slice %8 {offsets = [0, 32], sizes = [8, 32], strides = [1, 1]} : vector<8x96xf32> to vector<8x32xf32>
    %10 = arith.truncf %9 : vector<8x32xf32> to vector<8x32xbf16>
    %11 = vector.shape_cast %10 : vector<8x32xbf16> to vector<8x4x8xbf16>
    %12 = tpu.transpose %11, [1, 0, 2] : vector<8x4x8xbf16> -> vector<4x8x8xbf16>
    %13 = vector.extract_strided_slice %8 {offsets = [0, 64], sizes = [8, 32], strides = [1, 1]} : vector<8x96xf32> to vector<8x32xf32>
    %14 = arith.truncf %13 : vector<8x32xf32> to vector<8x32xbf16>
    %15 = vector.shape_cast %14 : vector<8x32xbf16> to vector<8x4x8xbf16>
    %16 = tpu.transpose %15, [1, 0, 2] : vector<8x4x8xbf16> -> vector<4x8x8xbf16>
    %17 = vector.extract_strided_slice %8 {offsets = [0, 0], sizes = [8, 32], strides = [1, 1]} : vector<8x96xf32> to vector<8x32xf32>
    %18 = arith.truncf %17 : vector<8x32xf32> to vector<8x32xbf16>
    %19 = vector.shape_cast %18 : vector<8x32xbf16> to vector<8x4x8xbf16>
    %20 = tpu.transpose %19, [1, 0, 2] : vector<8x4x8xbf16> -> vector<4x8x8xbf16>
    %c0_9 = arith.constant 0 : index
    %c0_10 = arith.constant 0 : index
    %c0_11 = arith.constant 0 : index
    %21 = vector.load %arg16[%c0_9, %c0_10, %c0_11] : memref<4x8x8xbf16, #tpu.memory_space<vmem>>, vector<4x8x8xbf16>
    tpu.vector_store %arg16[%c0_9, %c0_10, %c0_11], %20 {strides = array<i32>} : memref<4x8x8xbf16, #tpu.memory_space<vmem>>, vector<4x8x8xbf16>,
    %c0_i32 = arith.constant 0 : i32
    %c8_i32 = arith.constant 8 : i32
    %22 = arith.muli %c0_i32, %c8_i32 : i32
    %23 = tpu.assume_multiple %22, 8 : i32
    %c0_12 = arith.constant 0 : index
    %24 = arith.index_cast %23 : i32 to index
    %c0_13 = arith.constant 0 : index
    %25 = vector.load %arg16[%c0_12, %24, %c0_13] : memref<4x8x8xbf16, #tpu.memory_space<vmem>>, vector<4x8x8xbf16>
    "tpu.trace_start"() <{level = 10 : i32, message = "hqd,hkd->hqk"}> : () -> ()
    %cst_14 = arith.constant dense<0.000000e+00> : vector<4x8x8xf32>
    %26 = tpu.matmul %25, %12, %cst_14 {dimension_numbers = #tpu.dot_dimension_numbers<[2], [2], [1], [1], [0, 0, 0, 1, 1, 1], [0], [0]>} : vector<4x8x8xbf16>, vector<4x8x8xbf16>, vector<4x8x8xf32> -> vector<4x8x8xf32>
    "tpu.trace_stop"() : () -> ()
    %27 = vector.shape_cast %3 : vector<1x8xf32> to vector<1x1x8xf32>
    %28 = vector.broadcast %27 : vector<1x1x8xf32> to vector<4x8x8xf32>
    %29 = arith.addf %26, %28 : vector<4x8x8xf32>
    %cst_15 = arith.constant dense<0xFF800000> : vector<4x8xf32>
    %30 = vector.multi_reduction <maximumf>, %29, %cst_15 [2] : vector<4x8x8xf32> to vector<4x8xf32>
    %31 = vector.shape_cast %30 : vector<4x8xf32> to vector<4x8x1xf32>
    %32 = vector.broadcast %31 : vector<4x8x1xf32> to vector<4x8x8xf32>
    %33 = arith.subf %29, %32 : vector<4x8x8xf32>
    %34 = math.exp %33 : vector<4x8x8xf32>
    %cst_16 = arith.constant dense<0.000000e+00> : vector<4x8xf32>
    %35 = vector.multi_reduction <add>, %34, %cst_16 [2] : vector<4x8x8xf32> to vector<4x8xf32>
    %36 = vector.shape_cast %35 : vector<4x8xf32> to vector<4x8x1xf32>
    %37 = tpu.reciprocal %36 {approx = true} : vector<4x8x1xf32> -> vector<4x8x1xf32>
    %38 = vector.broadcast %37 : vector<4x8x1xf32> to vector<4x8x8xf32>
    %39 = arith.mulf %34, %38 : vector<4x8x8xf32>
    %40 = arith.truncf %39 : vector<4x8x8xf32> to vector<4x8x8xbf16>
    "tpu.trace_start"() <{level = 10 : i32, message = "hqk,hkd->hqd"}> : () -> ()
    %cst_17 = arith.constant dense<0.000000e+00> : vector<4x8x8xf32>
    %41 = tpu.matmul %40, %16, %cst_17 {dimension_numbers = #tpu.dot_dimension_numbers<[2], [1], [1], [2], [0, 0, 0, 1, 1, 2], [0], [0]>} : vector<4x8x8xbf16>, vector<4x8x8xbf16>, vector<4x8x8xf32> -> vector<4x8x8xf32>
    "tpu.trace_stop"() : () -> ()
    %42 = tpu.transpose %41, [1, 0, 2] : vector<4x8x8xf32> -> vector<8x4x8xf32>
    %43 = vector.shape_cast %42 : vector<8x4x8xf32> to vector<8x32xf32>
    %44 = arith.truncf %43 : vector<8x32xf32> to vector<8x32xbf16>
    %c0_18 = arith.constant 0 : index
    %c0_19 = arith.constant 0 : index
    %45 = vector.load %arg5[%c0_18, %c0_19] : memref<32x32xbf16, #tpu.memory_space<vmem>>, vector<32x32xbf16>
    %cst_20 = arith.constant dense<0.000000e+00> : vector<8x32xf32>
    %46 = tpu.matmul %44, %45, %cst_20 {dimension_numbers = #tpu.dot_dimension_numbers<[1], [0], [0], [1], [0, 0, 1, 1], [], []>} : vector<8x32xbf16>, vector<32x32xbf16>, vector<8x32xf32> -> vector<8x32xf32>
    %c0_21 = arith.constant 0 : index
    %c0_22 = arith.constant 0 : index
    %47 = vector.load %arg6[%c0_21, %c0_22] : memref<1x32xf32, #tpu.memory_space<vmem>>, vector<1x32xf32>
    %48 = vector.broadcast %47 : vector<1x32xf32> to vector<8x32xf32>
    %49 = arith.addf %46, %48 : vector<8x32xf32>
    %c0_23 = arith.constant 0 : index
    %50 = arith.index_cast %23 : i32 to index
    %c0_24 = arith.constant 0 : index
    %51 = vector.load %arg1[%c0_23, %50, %c0_24] : memref<1x8x32xbf16, #tpu.memory_space<vmem>>, vector<1x8x32xbf16>
    %52 = vector.shape_cast %51 : vector<1x8x32xbf16> to vector<8x32xbf16>
    %53 = arith.extf %52 : vector<8x32xbf16> to vector<8x32xf32>
    %54 = arith.addf %49, %53 : vector<8x32xf32>
    %c0_25 = arith.constant 0 : index
    %c0_26 = arith.constant 0 : index
    %55 = vector.load %arg7[%c0_25, %c0_26] : memref<1x32xf32, #tpu.memory_space<vmem>>, vector<1x32xf32>
    %c0_27 = arith.constant 0 : index
    %c0_28 = arith.constant 0 : index
    %56 = vector.load %arg8[%c0_27, %c0_28] : memref<1x32xf32, #tpu.memory_space<vmem>>, vector<1x32xf32>
    %cst_29 = arith.constant dense<0.000000e+00> : vector<8xf32>
    %57 = vector.multi_reduction <add>, %54, %cst_29 [1] : vector<8x32xf32> to vector<8xf32>
    %58 = vector.shape_cast %57 : vector<8xf32> to vector<8x1xf32>
    %cst_30 = arith.constant 3.200000e+01 : f32
    %59 = vector.broadcast %cst_30 : f32 to vector<8x1xf32>
    %60 = arith.divf %58, %59 : vector<8x1xf32>
    %61 = vector.broadcast %60 : vector<8x1xf32> to vector<8x32xf32>
    %62 = arith.subf %54, %61 : vector<8x32xf32>
    %63 = arith.mulf %62, %62 : vector<8x32xf32>
    %cst_31 = arith.constant dense<0.000000e+00> : vector<8xf32>
    %64 = vector.multi_reduction <add>, %63, %cst_31 [1] : vector<8x32xf32> to vector<8xf32>
    %65 = vector.shape_cast %64 : vector<8xf32> to vector<8x1xf32>
    %cst_32 = arith.constant 3.200000e+01 : f32
    %66 = vector.broadcast %cst_32 : f32 to vector<8x1xf32>
    %67 = arith.divf %65, %66 : vector<8x1xf32>
    %68 = vector.broadcast %60 : vector<8x1xf32> to vector<8x32xf32>
    %69 = arith.subf %54, %68 : vector<8x32xf32>
    %cst_33 = arith.constant 9.99999996E-13 : f32
    %70 = vector.broadcast %cst_33 : f32 to vector<8x1xf32>
    %71 = arith.addf %67, %70 : vector<8x1xf32>
    %72 = math.rsqrt %71 : vector<8x1xf32>
    %73 = vector.broadcast %72 : vector<8x1xf32> to vector<8x32xf32>
    %74 = arith.mulf %69, %73 : vector<8x32xf32>
    %75 = vector.broadcast %55 : vector<1x32xf32> to vector<8x32xf32>
    %76 = arith.mulf %74, %75 : vector<8x32xf32>
    %77 = vector.broadcast %56 : vector<1x32xf32> to vector<8x32xf32>
    %78 = arith.addf %76, %77 : vector<8x32xf32>
    %79 = arith.truncf %78 : vector<8x32xf32> to vector<8x32xbf16>
    %c0_34 = arith.constant 0 : index
    %c0_35 = arith.constant 0 : index
    %80 = vector.load %arg9[%c0_34, %c0_35] : memref<32x64xbf16, #tpu.memory_space<vmem>>, vector<32x64xbf16>
    %cst_36 = arith.constant dense<0.000000e+00> : vector<8x64xf32>
    %81 = tpu.matmul %79, %80, %cst_36 {dimension_numbers = #tpu.dot_dimension_numbers<[1], [0], [0], [1], [0, 0, 1, 1], [], []>} : vector<8x32xbf16>, vector<32x64xbf16>, vector<8x64xf32> -> vector<8x64xf32>
    %c0_37 = arith.constant 0 : index
    %c0_38 = arith.constant 0 : index
    %82 = vector.load %arg10[%c0_37, %c0_38] : memref<1x64xf32, #tpu.memory_space<vmem>>, vector<1x64xf32>
    %83 = vector.broadcast %82 : vector<1x64xf32> to vector<8x64xf32>
    %84 = arith.addf %81, %83 : vector<8x64xf32>
    %cst_39 = arith.constant 5.000000e-01 : f32
    %85 = vector.broadcast %cst_39 : f32 to vector<8x64xf32>
    %86 = arith.mulf %85, %84 : vector<8x64xf32>
    %87 = arith.mulf %84, %84 : vector<8x64xf32>
    %88 = arith.mulf %87, %84 : vector<8x64xf32>
    %cst_40 = arith.constant 4.471500e-02 : f32
    %89 = vector.broadcast %cst_40 : f32 to vector<8x64xf32>
    %90 = arith.mulf %89, %88 : vector<8x64xf32>
    %91 = arith.addf %84, %90 : vector<8x64xf32>
    %cst_41 = arith.constant 0.797884583 : f32
    %92 = vector.broadcast %cst_41 : f32 to vector<8x64xf32>
    %93 = arith.mulf %92, %91 : vector<8x64xf32>
    %94 = math.tanh %93 : vector<8x64xf32>
    %cst_42 = arith.constant 1.000000e+00 : f32
    %95 = vector.broadcast %cst_42 : f32 to vector<8x64xf32>
    %96 = arith.addf %95, %94 : vector<8x64xf32>
    %97 = arith.mulf %86, %96 : vector<8x64xf32>
    %98 = arith.truncf %97 : vector<8x64xf32> to vector<8x64xbf16>
    %c0_43 = arith.constant 0 : index
    %c0_44 = arith.constant 0 : index
    %99 = vector.load %arg11[%c0_43, %c0_44] : memref<64x32xbf16, #tpu.memory_space<vmem>>, vector<64x32xbf16>
    %cst_45 = arith.constant dense<0.000000e+00> : vector<8x32xf32>
    %100 = tpu.matmul %98, %99, %cst_45 {dimension_numbers = #tpu.dot_dimension_numbers<[1], [0], [0], [1], [0, 0, 1, 1], [], []>} : vector<8x64xbf16>, vector<64x32xbf16>, vector<8x32xf32> -> vector<8x32xf32>
    %c0_46 = arith.constant 0 : index
    %c0_47 = arith.constant 0 : index
    %101 = vector.load %arg12[%c0_46, %c0_47] : memref<1x32xf32, #tpu.memory_space<vmem>>, vector<1x32xf32>
    %102 = vector.broadcast %101 : vector<1x32xf32> to vector<8x32xf32>
    %103 = arith.addf %100, %102 : vector<8x32xf32>
    %104 = arith.addf %103, %78 : vector<8x32xf32>
    %c0_48 = arith.constant 0 : index
    %c0_49 = arith.constant 0 : index
    %105 = vector.load %arg13[%c0_48, %c0_49] : memref<1x32xf32, #tpu.memory_space<vmem>>, vector<1x32xf32>
    %c0_50 = arith.constant 0 : index
    %c0_51 = arith.constant 0 : index
    %106 = vector.load %arg14[%c0_50, %c0_51] : memref<1x32xf32, #tpu.memory_space<vmem>>, vector<1x32xf32>
    %cst_52 = arith.constant dense<0.000000e+00> : vector<8xf32>
    %107 = vector.multi_reduction <add>, %104, %cst_52 [1] : vector<8x32xf32> to vector<8xf32>
    %108 = vector.shape_cast %107 : vector<8xf32> to vector<8x1xf32>
    %cst_53 = arith.constant 3.200000e+01 : f32
    %109 = vector.broadcast %cst_53 : f32 to vector<8x1xf32>
    %110 = arith.divf %108, %109 : vector<8x1xf32>
    %111 = vector.broadcast %110 : vector<8x1xf32> to vector<8x32xf32>
    %112 = arith.subf %104, %111 : vector<8x32xf32>
    %113 = arith.mulf %112, %112 : vector<8x32xf32>
    %cst_54 = arith.constant dense<0.000000e+00> : vector<8xf32>
    %114 = vector.multi_reduction <add>, %113, %cst_54 [1] : vector<8x32xf32> to vector<8xf32>
    %115 = vector.shape_cast %114 : vector<8xf32> to vector<8x1xf32>
    %cst_55 = arith.constant 3.200000e+01 : f32
    %116 = vector.broadcast %cst_55 : f32 to vector<8x1xf32>
    %117 = arith.divf %115, %116 : vector<8x1xf32>
    %118 = vector.broadcast %110 : vector<8x1xf32> to vector<8x32xf32>
    %119 = arith.subf %104, %118 : vector<8x32xf32>
    %cst_56 = arith.constant 9.99999996E-13 : f32
    %120 = vector.broadcast %cst_56 : f32 to vector<8x1xf32>
    %121 = arith.addf %117, %120 : vector<8x1xf32>
    %122 = math.rsqrt %121 : vector<8x1xf32>
    %123 = vector.broadcast %122 : vector<8x1xf32> to vector<8x32xf32>
    %124 = arith.mulf %119, %123 : vector<8x32xf32>
    %125 = vector.broadcast %105 : vector<1x32xf32> to vector<8x32xf32>
    %126 = arith.mulf %124, %125 : vector<8x32xf32>
    %127 = vector.broadcast %106 : vector<1x32xf32> to vector<8x32xf32>
    %128 = arith.addf %126, %127 : vector<8x32xf32>
    %129 = arith.truncf %128 : vector<8x32xf32> to vector<8x32xbf16>
    %c0_57 = arith.constant 0 : index
    %130 = arith.index_cast %23 : i32 to index
    %c0_58 = arith.constant 0 : index
    %131 = vector.load %arg15[%c0_57, %130, %c0_58] : memref<1x8x32xbf16, #tpu.memory_space<vmem>>, vector<1x8x32xbf16>
    %132 = vector.shape_cast %131 : vector<1x8x32xbf16> to vector<8x32xbf16>
    %133 = vector.shape_cast %129 : vector<8x32xbf16> to vector<1x8x32xbf16>
    tpu.vector_store %arg15[%c0_57, %130, %c0_58], %133 {strides = array<i32>} : memref<1x8x32xbf16, #tpu.memory_space<vmem>>, vector<1x8x32xbf16>,
    %c1_i32 = arith.constant 1 : i32
    return
  }
  func.func @transform_0(%arg0: i32) -> (i32, i32, i32) {
    %c0_i32 = arith.constant 0 : i32
    %c0_i32_0 = arith.constant 0 : i32
    %c0_i32_1 = arith.constant 0 : i32
    return %arg0, %c0_i32, %c0_i32_0 : i32, i32, i32
  }
  func.func @transform_1(%arg0: i32) -> (i32, i32, i32) {
    %c0_i32 = arith.constant 0 : i32
    %c0_i32_0 = arith.constant 0 : i32
    %c0_i32_1 = arith.constant 0 : i32
    return %arg0, %c0_i32, %c0_i32_0 : i32, i32, i32
  }
  func.func @transform_2(%arg0: i32) -> (i32, i32) {
    %c0_i32 = arith.constant 0 : i32
    %c0_i32_0 = arith.constant 0 : i32
    %c0_i32_1 = arith.constant 0 : i32
    return %c0_i32, %c0_i32_0 : i32, i32
  }
  func.func @transform_3(%arg0: i32) -> (i32, i32) {
    %c0_i32 = arith.constant 0 : i32
    %c0_i32_0 = arith.constant 0 : i32
    %c0_i32_1 = arith.constant 0 : i32
    return %c0_i32, %c0_i32_0 : i32, i32
  }
  func.func @transform_4(%arg0: i32) -> (i32, i32) {
    %c0_i32 = arith.constant 0 : i32
    %c0_i32_0 = arith.constant 0 : i32
    %c0_i32_1 = arith.constant 0 : i32
    return %c0_i32, %c0_i32_0 : i32, i32
  }
  func.func @transform_5(%arg0: i32) -> (i32, i32) {
    %c0_i32 = arith.constant 0 : i32
    %c0_i32_0 = arith.constant 0 : i32
    %c0_i32_1 = arith.constant 0 : i32
    return %c0_i32, %c0_i32_0 : i32, i32
  }
  func.func @transform_6(%arg0: i32) -> (i32, i32) {
    %c0_i32 = arith.constant 0 : i32
    %c0_i32_0 = arith.constant 0 : i32
    %c0_i32_1 = arith.constant 0 : i32
    return %c0_i32, %c0_i32_0 : i32, i32
  }
  func.func @transform_7(%arg0: i32) -> (i32, i32) {
    %c0_i32 = arith.constant 0 : i32
    %c0_i32_0 = arith.constant 0 : i32
    %c0_i32_1 = arith.constant 0 : i32
    return %c0_i32, %c0_i32_0 : i32, i32
  }
  func.func @transform_8(%arg0: i32) -> (i32, i32) {
    %c0_i32 = arith.constant 0 : i32
    %c0_i32_0 = arith.constant 0 : i32
    %c0_i32_1 = arith.constant 0 : i32
    return %c0_i32, %c0_i32_0 : i32, i32
  }
  func.func @transform_9(%arg0: i32) -> (i32, i32) {
    %c0_i32 = arith.constant 0 : i32
    %c0_i32_0 = arith.constant 0 : i32
    %c0_i32_1 = arith.constant 0 : i32
    return %c0_i32, %c0_i32_0 : i32, i32
  }
  func.func @transform_10(%arg0: i32) -> (i32, i32) {
    %c0_i32 = arith.constant 0 : i32
    %c0_i32_0 = arith.constant 0 : i32
    %c0_i32_1 = arith.constant 0 : i32
    return %c0_i32, %c0_i32_0 : i32, i32
  }
  func.func @transform_11(%arg0: i32) -> (i32, i32) {
    %c0_i32 = arith.constant 0 : i32
    %c0_i32_0 = arith.constant 0 : i32
    %c0_i32_1 = arith.constant 0 : i32
    return %c0_i32, %c0_i32_0 : i32, i32
  }
  func.func @transform_12(%arg0: i32) -> (i32, i32) {
    %c0_i32 = arith.constant 0 : i32
    %c0_i32_0 = arith.constant 0 : i32
    %c0_i32_1 = arith.constant 0 : i32
    return %c0_i32, %c0_i32_0 : i32, i32
  }
  func.func @transform_13(%arg0: i32) -> (i32, i32) {
    %c0_i32 = arith.constant 0 : i32
    %c0_i32_0 = arith.constant 0 : i32
    %c0_i32_1 = arith.constant 0 : i32
    return %c0_i32, %c0_i32_0 : i32, i32
  }
  func.func @transform_14(%arg0: i32) -> (i32, i32, i32) {
    %c0_i32 = arith.constant 0 : i32
    %c0_i32_0 = arith.constant 0 : i32
    %c0_i32_1 = arith.constant 0 : i32
    return %arg0, %c0_i32, %c0_i32_0 : i32, i32, i32
  }
}

</mosaic_0001>

<bundles_post_ra>
// kernel: tpu_custom_call.1
= control target key start
LH: loop header
LB: loop body
LE: loop exit
PB: predicated region body
PF: predicated region fallthrough
CT: control target
= control target key end

     0   :  { %s2911_s0 = inlined_call_operand.hbm [shape: bf16[2,8,32], index: 0, kind: input, shape index: {}]   ;;  %s2912_s1 = inlined_call_operand.vmem [shape: f32[2,1,8], index: 1, kind: input, shape index: {}]   ;;  %s2913_s2 = inlined_call_operand.vmem [shape: bf16[32,96], index: 2, kind: input, shape index: {}]   ;;  %s2914_s3 = inlined_call_operand.vmem [shape: f32[1,96], index: 3, kind: input, shape index: {}]   ;;  %s2915_s4 = inlined_call_operand.vmem [shape: bf16[32,32], index: 4, kind: input, shape index: {}]   ;;  %s2916_s5 = inlined_call_operand.vmem [shape: f32[1,32], index: 5, kind: input, shape index: {}]   ;;  %s2917_s6 = inlined_call_operand.vmem [shape: f32[1,32], index: 6, kind: input, shape index: {}]   ;;  %s2918_s7 = inlined_call_operand.vmem [shape: f32[1,32], index: 7, kind: input, shape index: {}]   ;;  %s2919_s8 = inlined_call_operand.vmem [shape: bf16[32,64], index: 8, kind: input, shape index: {}]   ;;  %s2920_s9 = inlined_call_operand.vmem [shape: f32[1,64], index: 9, kind: input, shape index: {}]   ;;  %s2921_s10 = inlined_call_operand.vmem [shape: bf16[64,32], index: 10, kind: input, shape index: {}]   ;;  %s2922_s11 = inlined_call_operand.vmem [shape: f32[1,32], index: 11, kind: input, shape index: {}]   ;;  %s2923_s12 = inlined_call_operand.vmem [shape: f32[1,32], index: 12, kind: input, shape index: {}]   ;;  %s2924_s13 = inlined_call_operand.vmem [shape: f32[1,32], index: 13, kind: input, shape index: {}]   ;;  %s2925_s14 = inlined_call_operand.hbm [shape: bf16[2,8,32], index: 14, kind: output, shape index: {}]  }
   0x1   :  { %2932 = sst [smem:[#allocation13_spill]] %s2911_s0 }
   0x2   :  { %2933 = sst [smem:[#allocation14_spill]] %s2925_s14 }
   0x3   :  { %19 = vsyncpa [#allocation4], 0 }
   0x4   :  { %21 = vsyncpa [#allocation4 + $0x1], 0 }
   0x5   :  { %22 = vsyncpa [#allocation5], 0 }
   0x6   :  { %24 = vsyncpa [#allocation5 + $0x1], 0  ;;  %s2490_s29 = smov 0   ;;  %s2492_s30 = smov 0  }
   0x7   :  { %s2494_s15 = smov 0   ;;  %s2496_s16 = smov 0  }
   0x8 LB: > { %2934 = sst [smem:[#allocation9_spill]] %s2386_s29  ;;  %s2511_s17 = sadd.s32 4294967295, %s2398_s16   ;;  %s2398_s16 = sphi %s2496_s16, %s2951_s16   ;;  %s2394_s15 = sphi %s2494_s15, %s2956_s15   ;;  %s2390_s30 = sphi %s2492_s30, %s2955_s30   ;;  %s2386_s29 = sphi %s2490_s29, %s2954_s29  }
   0x9   : > { %2935 = sst [smem:[#allocation10_spill]] %s2394_s15  ;;  %s2052_s18 = sadd.s32 4294967294, %s2398_s16  }
   0xa   : > { %s2515_s19 = sadd.s32 1, %s2398_s16   ;;  %s37_s20 = sadd.s32 1, %s2394_s15 }
   0xb   : > { %2936 = sst [smem:[#allocation11_spill]] %s2515_s19  ;;  %s34_s21 = ssub.s32 %s2398_s16, %s2515_s19 }
   0xc   : > { %p44_p0 = scmp.ne.s32.totalorder %s2394_s15, %s2390_s30  ;;  %p35_p1 = scmp.eq.s32.totalorder %s34_s21, 0 }
   0xd   : > { %p45_p2 = scmp.eq.s32.totalorder %s2398_s16, 0  ;;  %p50_p3 = scmp.ne.s32.totalorder %s2390_s30, %s2386_s29 }
   0xe   : > { %p51_p4 = scmp.eq.s32.totalorder %s2511_s17, 0  ;;  %p352_p7 = scmp.eq.s32.totalorder %s2511_s17, 1 }
   0xf   : > { %s2527_s22 = scalar_select %p35_p1, %s2394_s15, %s37_s20  }
  0x10   : > { %p2529_p5 = por %p45_p2, %p44_p0  ;;  %p2533_p6 = por %p51_p4, %p50_p3 }
  0x11   : > { %2937 = sst [smem:[#allocation12_spill]] %s2527_s22  ;;  %p358_p8 = scmp.eq.s32.totalorder %s2052_s18, 1 }
  0x12   : > { %p2223_p10 = scmp.lt.s32.totalorder %s2398_s16, 2  ;;  %p2540_p11 = por %p352_p7, %p44_p0 }
  0x13   : > { %p2544_p12 = por %p358_p8, %p50_p3  ;;  %s414_s27 = sand.u32 1, %s2394_s15  }
  0x14   : > { %s2940_s25 = scalar_select %p2540_p11, 1, 0 }
  0x15   : > { %s2941_s26 = scalar_select %p2544_p12, 1, 0 }
  0x16   : > { %s2056_s28 = sshll.u32 %s2398_s16, 6  ;;  %s2055_s20 = sshll.u32 %s414_s27, 2 }
  0x17   : > { %s2942_s0 = sld [smem:[#allocation13_spill]]  ;;  %s418_s18 = scalar_lea.vmem [#allocation3], %s2055_s20 }
  0x18   : > { %s425_s29 = sshll.u32 %s418_s18, 4  ;;  %p2557_p13 = pnand %p2223_p10, %p2529_p5  ;;  %s2561_s29 = int_to_ptr.vmem [resolvable:$true] %s425_s29 }
  0x19   : > { %s415_s22 = scalar_lea.sflag [#allocation4], %s414_s27 }
  0x1a   : > { %p2304_p3 = pneg %p2557_p13 }
  0x1d   : > { %s2553_s19 = scalar_lea.hbm %s2942_s0, %s2056_s28  ;;  %s2307_s21 = scalar_lea.hbm %s2942_s0, 128 }
  0x1e   : > { %s2302_s28 = scalar_lea.hbm %s2553_s19, 64  ;;  %p2308_p5 = scmp.lt.u32.totalorder %s2553_s19, %s2942_s0 }
  0x1f   : > { %p2303_p2 = scmp.ne.s32.totalorder %s2553_s19, %s2302_s28  ;;  %p2309_p8 = scmp.lt.u32.totalorder %s2307_s21, %s2302_s28 }
  0x20   : > { %p2311_p9 = scmp.lt.u32.totalorder %s2302_s28, %s2553_s19 }
  0x21   : > { %p2305_p4 = pnand %p2304_p3, %p2303_p2  ;;  %p2310_p10 = por %p2309_p8, %p2308_p5 }
  0x23   : > { %p2306_p7 = pneg %p2305_p4  ;;  %p2312_p0 = por %p2311_p9, %p2310_p10 }
  0x25   : > { %p2313_p1 = pnand %p2312_p0, %p2306_p7 }
  0x27   : > { %2316 = shalt.err (!%p2313_p1)
}
  0x28   : > { %s2317_s27 = scalar_lea.vmem %s2561_s29, 64  ;;  %s2400_s23 = smov [#allocation3]  }
  0x29   : > { %p2318_p2 = scmp.ne.s32.totalorder %s2561_s29, %s2317_s27  ;;  %s2322_s20 = sshll.u32 %s2400_s23, 4  ;;  %s2323_s20 = int_to_ptr.vmem [resolvable:$false] %s2322_s20 }
  0x2a   : > { %s2324_s15 = scalar_lea.vmem %s2323_s20, 128  ;;  %p2325_p11 = scmp.lt.s32.totalorder %s2561_s29, %s2323_s20 }
  0x2b   : > { %p2320_p4 = pnand %p2318_p2, %p2304_p3  ;;  %p2326_p5 = scmp.lt.s32.totalorder %s2324_s15, %s2317_s27 }
  0x2d   : > { %p2321_p12 = pneg %p2320_p4  ;;  %p2327_p8 = por %p2326_p5, %p2325_p11 }
  0x2f   : > { %p2328_p9 = pnand %p2327_p8, %p2321_p12 }
  0x31   : > { %2331 = shalt.err (!%p2328_p9)
}
  0x32   : > { %2218 = dma.hbm_to_vmem [thread:$0]  (!%p2557_p13), %s2553_s19, 64, %s2561_s29, %s415_s22  }
  0x33   : > { %p2944_p0 = scmp.lt.s32.totalorder %s2398_s16, 3  ;;  %p2945_p1 = scmp.ge.s32.totalorder %s2398_s16, 1 }
  0x35   : > { %p437_p3 = pnand %p2945_p1, %p2944_p0 }
  0x36   : > { %s2595_s28 = sand.u32 (!%p437_p3), 1, %s2390_s30  }
  0x37   : > { %440 = sbr.rel (%p437_p3) target bundleno = 2808 (0xaf8), region = 76  ;;  %s2058_s21 = sshll.u32 (!%p437_p3), %s2595_s28, 2 }
  0x38   : > { %s443_s18 = scalar_lea.sflag (!%p437_p3), [#allocation4], %s2595_s28  ;;  %s2601_s14 = scalar_lea.vmem (!%p437_p3), [#allocation3], %s2058_s21 }
  0x3e   : > { %2377 = dma.done.wait (%p2533_p6), %s443_s18, 64  }
  0x3f   : > { %2379 = vsyncadd (%p2533_p6), %s443_s18, 4294967232  ;;  %v2401_v0 = vmov 0.0   ;;  %vm2402_vm0 = vmmov 0   ;;  %v2270_v1 = vld [vmem:[%s2913_s2] sm:$0xff]   ;;  %v2271_v2 = vld [vmem:[%s2913_s2 + $0x8] sm:$0xff]   ;;  %vm523_vm1 = vcmask 261120   ;;  %v587_v13 = vlaneseq }
  0x40   : > { %2127 = vmatprep.subr.bf16.mxu0 %v2401_v0  ;;  %2131 = vmatprep.mubr.msk.bf16.mxu0 %vm2402_vm0, %v2401_v0  ;;  %v498_v3 = vld [vmem:[%s2601_s14] sm:$0xf]  ;;  %v2060_v4 = vld [vmem:[%s2914_s3] ss:$0 sm:$0xff]  ;;  %s2403_s20 = smov 104   ;;  %s2404_s15 = smov 120  }
  0x41   : > { %2135 = vmatprep.subr.bf16.mxu1 %v2401_v0  ;;  %2137 = vmatprep.mubr.msk.bf16.mxu1 %vm2402_vm0, %v2401_v0  ;;  %s2405_s18 = smov 96   ;;  %s2406_s29 = smov 112   ;;  %v2407_v11 = vmov 1983009808   ;;  %v2408_v14 = vmov 1934713408  }
  0x42   : > { %2128 = vmatpush3.bf16.msra.mxu0 %v2270_v1  ;;  %v585_v12 = vunpack.c.l.s4 %v2407_v11  ;;  %v602_v15 = vunpack.c.l.s4 %v2408_v14  ;;  %v588_v17 = vshrl.u32 %v587_v13, 7  ;;  %v2409_v34 = vmov 0   ;;  %p494_p6 = scmp.lt.s32.totalorder %s2511_s17, 1  ;;  %s2410_s23 = smov 64  }
  0x43   : > { %2129 = vmatprep.subr.bf16.mxu0 %v2401_v0  ;;  %vm1080_vm2 = vcmask 60416   ;;  %vm1095_vm3 = vcmask 64512   ;;  %vm1331_vm4 = vcmask 1043456   ;;  %s2412_s24 = smov 8   ;;  %s2413_s22 = smov 24   ;;  %vm1662_vm5 = vcmask 130048  }
  0x44   : > { %v586_v16 = vunpack.c.0.s8 %v585_v12  ;;  %v603_v18 = vunpack.c.0.s8 %v602_v15  ;;  %s495_s19 = scalar_select %p494_p6, %s2511_s17, 1  ;;  %vm1664_vm6 = vcmask 195584   ;;  %vm1882_vm7 = vcmask 523264  }
  0x45   : > { %vm1957_vm8 = vcmask 257024   ;;  %p2947_p12 = scmp.ne.s32.totalorder %s2940_s25, 0 }
  0x46   : > { %2130 = vmatpush3.bf16.msra.mxu0 %v2271_v2  ;;  %v2634_v19 = vsub.s32 %v586_v16, %v588_v17  ;;  %v2642_v23 = vsub.s32 %v603_v18, %v588_v17  ;;  %s496_s27 = scalar_lea.vmem %s2912_s1, %s495_s19  ;;  %s2411_s19 = smov 16  }
  0x47   : > { %2141 = vmatprep.subr.bf16.mxu0 %v2401_v0 }
  0x49   : > { %2132 = vmatmul.mubr.msk.bf16.vlgmr.msra.gmra.mrb[0].mxu0 %vm523_vm1, %v498_v3 }
  0x4a   : > { %2143 = vmatprep.mubr.msk.bf16.mxu0 %vm2402_vm0, %v2401_v0 }
 0x11c   : > { %v561_v5 = vpop.f32.mrb[0].mxu0 }
 0x11d   : > { %v562_v6 = vadd.f32 %v2060_v4, %v561_v5  ;;  %v2133_v7 = vpop.f32.mrb[1].mxu0 }
 0x11e   : > { %v564_v8 = vpop.f32.mrb[2].mxu0 }
 0x11f   : > { %v2628_v9 = vpack.c.bf16 %v562_v6, %v562_v6  ;;  %v2134_v10 = vpop.f32.mrb[3].mxu0 }
 0x121   : > { %573 = vrot.lane.b32.xlu1 %v2628_v9, %s2403_s20  ;;  %569 = vrot.lane.b32.xlu0 %v2628_v9, %s2404_s15  ;;  %v921_v30 = vrot.slane %v2628_v9, %v2634_v19 }
 0x125   : > { %575 = vrot.lane.b32.xlu1 %v2628_v9, %s2405_s18  ;;  %571 = vrot.lane.b32.xlu0 %v2628_v9, %s2406_s29  ;;  %s2094_s29 = sshll.u32 %s2511_s17, 6  ;;  %s2414_s17 = smov [#allocation6]  }
 0x193   : > { %v2636_v20 = vpop.permute.xlu1 %573  ;;  %v2638_v21 = vpop.permute.xlu0 %569 }
 0x194   : > { %v963_v22 = vrot.slane %v2636_v20, %v2634_v19  ;;  %v955_v24 = vrot.slane %v2638_v21, %v2634_v19  ;;  %577 = vrot.lane.b32.xlu0 %v2638_v21, %s2405_s18 }
 0x196   : > { %v964_v25 = vcombine.low %v955_v24, %v963_v22  ;;  %v965_v26 = vcombine.high %v955_v24, %v963_v22 }
 0x197   : > { %v2647_v27 = vpop.permute.xlu0 %571  ;;  %v576_v18 = vpop.permute.xlu1 %575 }
 0x198   : > { %v972_v28 = vrot.slane %v964_v25, %v2642_v23  ;;  %v929_v29 = vrot.slane %v2647_v27, %v2634_v19  ;;  %581 = vrot.lane.b32.xlu0 %v2636_v20, %s2405_s18  ;;  %579 = vrot.lane.b32.xlu1 %v2647_v27, %s2405_s18  ;;  %v979_v31 = vrot.slane %v965_v26, %v2642_v23 }
 0x19a   : > { %v930_v32 = vcombine.low %v921_v30, %v929_v29  ;;  %v931_v33 = vcombine.high %v921_v30, %v929_v29  ;;  %v980_v35 = vcombine.high %v972_v28, %v2409_v34  ;;  %v981_v38 = vcombine.high %v979_v31, %v2409_v34 }
 0x19b   : > { %v987_v39 = vshrl.u32 %v972_v28, 16  ;;  %v1003_v45 = vshrl.u32 %v979_v31, 16 }
 0x19c   : > { %v938_v36 = vrot.slane %v930_v32, %v2642_v23  ;;  %v945_v37 = vrot.slane %v931_v33, %v2642_v23  ;;  %v995_v44 = vshrl.u32 %v980_v35, 16  ;;  %v1011_v52 = vshrl.u32 %v981_v38, 16 }
 0x19e   : > { %v946_v40 = vcombine.high %v938_v36, %v2409_v34  ;;  %v947_v41 = vcombine.high %v945_v37, %v2409_v34  ;;  %v984_v42 = vpack.i.b16 %v972_v28, %v938_v36  ;;  %v986_v43 = vshrl.u32 %v938_v36, 16 }
 0x19f   : > { %v1000_v46 = vpack.i.b16 %v979_v31, %v945_v37  ;;  %v1002_v47 = vshrl.u32 %v945_v37, 16  ;;  %v590_v28 = vrot.slane %v576_v18, %v2634_v19 }
 0x1a0   : > { %v988_v48 = vpack.i.b16 %v987_v39, %v986_v43  ;;  %v992_v49 = vpack.i.b16 %v980_v35, %v946_v40  ;;  %v994_v50 = vshrl.u32 %v946_v40, 16  ;;  %v1008_v51 = vpack.i.b16 %v981_v38, %v947_v41 }
 0x1a1   : > { %v1004_v53 = vpack.i.b16 %v1003_v45, %v1002_v47  ;;  %v1010_v54 = vshrl.u32 %v947_v41, 16  ;;  %v1014_v55 = vcombine.low %v984_v42, %v1000_v46 }
 0x1a2   : > { %v996_v56 = vpack.i.b16 %v995_v44, %v994_v50  ;;  %v1022_v57 = vcombine.low %v992_v49, %v1008_v51 }
 0x1a3   : > { %v1012_v58 = vpack.i.b16 %v1011_v52, %v1010_v54  ;;  %v1039_v59 = vcombine.low %v988_v48, %v1004_v53  ;;  %v1021_v60 = vrot.slane %v1014_v55, %v2634_v19 }
 0x1a4   : > { %v1029_v61 = vrot.slane %v1022_v57, %v2634_v19 }
 0x1a5   : > { %v1047_v62 = vcombine.low %v996_v56, %v1012_v58  ;;  %v1046_v1 = vrot.slane %v1039_v59, %v2634_v19 }
 0x1a6   : > { %v1030_v63 = vcombine.low %v1021_v60, %v1029_v61 }
 0x1a7   : > { %v1054_v2 = vrot.slane %v1047_v62, %v2634_v19 }
 0x1a8   : > { %v1037_v3 = vrot.slane %v1030_v63, %v2642_v23 }
 0x1a9   : > { %v1055_v4 = vcombine.low %v1046_v1, %v1054_v2 }
 0x1aa   : > { %v1038_v5 = vcombine.high %v1037_v3, %v2409_v34  ;;  %v1068_v10 = vshrl.u32 %v1037_v3, 16 }
 0x1ab   : > { %v1062_v6 = vrot.slane %v1055_v4, %v2642_v23 }
 0x1ac   : > { %v1076_v14 = vshrl.u32 %v1038_v5, 16 }
 0x1ad   : > { %v1063_v7 = vcombine.high %v1062_v6, %v2409_v34  ;;  %v1066_v8 = vpack.i.b16 %v1062_v6, %v1037_v3  ;;  %v1069_v11 = vshrl.u32 %v1062_v6, 16 }
 0x1af   : > { %v1070_v12 = vpack.i.b16 %v1069_v11, %v1068_v10  ;;  %v1074_v13 = vpack.i.b16 %v1063_v7, %v1038_v5  ;;  %v1077_v15 = vshrl.u32 %v1063_v7, 16  ;;  %1081 = vst.msk [vmem:[#allocation2] sm:$0xf] %vm1080_vm2, %v1066_v8 }
 0x1b1   : > { %v1078_v16 = vpack.i.b16 %v1077_v15, %v1076_v14  ;;  %1082 = vst.msk [vmem:[#allocation2 + $0x4] sm:$0xf] %vm1080_vm2, %v1070_v12  ;;  %1083 = vst.msk [vmem:[#allocation2 + $0x8] sm:$0xf] %vm1080_vm2, %v1074_v13 }
 0x1b3   : > { %1084 = vst.msk [vmem:[#allocation2 + $0xc] sm:$0xf] %vm1080_vm2, %v1078_v16 }
 0x206   : > { %v578_v17 = vpop.permute.xlu0 %577 }
 0x207   : > { %v624_v24 = vrot.slane %v578_v17, %v2634_v19 }
 0x20a   : > { %v582_v22 = vpop.permute.xlu0 %581  ;;  %v580_v25 = vpop.permute.xlu1 %579 }
 0x20b   : > { %v632_v26 = vrot.slane %v582_v22, %v2634_v19  ;;  %v598_v29 = vrot.slane %v580_v25, %v2634_v19  ;;  %v1085_v25 = vld [vmem:[#allocation2] sm:$0xf] }
 0x20d   : > { %v633_v30 = vcombine.low %v624_v24, %v632_v26  ;;  %v634_v31 = vcombine.high %v624_v24, %v632_v26  ;;  %v599_v32 = vcombine.low %v590_v28, %v598_v29  ;;  %v600_v33 = vcombine.high %v590_v28, %v598_v29  ;;  %v1086_v28 = vld [vmem:[#allocation2 + $0x4] sm:$0xf] }
 0x20f   : > { %v641_v35 = vrot.slane %v633_v30, %v2642_v23  ;;  %v648_v36 = vrot.slane %v634_v31, %v2642_v23  ;;  %v607_v37 = vrot.slane %v599_v32, %v2642_v23  ;;  %v614_v38 = vrot.slane %v600_v33, %v2642_v23  ;;  %v1087_v30 = vld [vmem:[#allocation2 + $0x8] sm:$0xf]  ;;  %v1088_v31 = vld [vmem:[#allocation2 + $0xc] sm:$0xf]  ;;  %v2064_v32 = vld [vmem:[%s496_s27] ss:$0 sm:$0xff] }
 0x211   : > { %v649_v39 = vcombine.high %v641_v35, %v2409_v34  ;;  %v650_v40 = vcombine.high %v648_v36, %v2409_v34  ;;  %v656_v41 = vshrl.u32 %v641_v35, 16  ;;  %v672_v42 = vshrl.u32 %v648_v36, 16 }
 0x212   : > { %v615_v43 = vcombine.high %v607_v37, %v2409_v34  ;;  %v616_v44 = vcombine.high %v614_v38, %v2409_v34  ;;  %v655_v45 = vshrl.u32 %v607_v37, 16  ;;  %v671_v46 = vshrl.u32 %v614_v38, 16 }
 0x213   : > { %v653_v47 = vpack.i.b16 %v641_v35, %v607_v37  ;;  %v664_v48 = vshrl.u32 %v649_v39, 16  ;;  %v669_v49 = vpack.i.b16 %v648_v36, %v614_v38  ;;  %v680_v50 = vshrl.u32 %v650_v40, 16 }
 0x214   : > { %v663_v51 = vshrl.u32 %v615_v43, 16  ;;  %v679_v52 = vshrl.u32 %v616_v44, 16  ;;  %v657_v53 = vpack.i.b16 %v656_v41, %v655_v45  ;;  %v661_v54 = vpack.i.b16 %v649_v39, %v615_v43 }
 0x215   : > { %v673_v55 = vpack.i.b16 %v672_v42, %v671_v46  ;;  %v677_v56 = vpack.i.b16 %v650_v40, %v616_v44  ;;  %v683_v57 = vcombine.low %v653_v47, %v669_v49 }
 0x216   : > { %v665_v58 = vpack.i.b16 %v664_v48, %v663_v51  ;;  %v681_v59 = vpack.i.b16 %v680_v50, %v679_v52 }
 0x217   : > { %v691_v60 = vcombine.low %v661_v54, %v677_v56  ;;  %v708_v61 = vcombine.low %v657_v53, %v673_v55  ;;  %v690_v63 = vrot.slane %v683_v57, %v2634_v19 }
 0x218   : > { %v716_v62 = vcombine.low %v665_v58, %v681_v59 }
 0x219   : > { %v698_v1 = vrot.slane %v691_v60, %v2634_v19  ;;  %v715_v2 = vrot.slane %v708_v61, %v2634_v19 }
 0x21a   : > { %v723_v3 = vrot.slane %v716_v62, %v2634_v19 }
 0x21b   : > { %v699_v4 = vcombine.low %v690_v63, %v698_v1 }
 0x21c   : > { %v724_v5 = vcombine.low %v715_v2, %v723_v3 }
 0x21d   : > { %v706_v6 = vrot.slane %v699_v4, %v2642_v23 }
 0x21e   : > { %v731_v7 = vrot.slane %v724_v5, %v2642_v23 }
 0x21f   : > { %v736_v10 = vshrl.u32 %v706_v6, 16  ;;  %v707_v15 = vcombine.high %v706_v6, %v2409_v34 }
 0x220   : > { %v735_v8 = vpack.i.b16 %v731_v7, %v706_v6  ;;  %v737_v11 = vshrl.u32 %v731_v7, 16  ;;  %v732_v12 = vcombine.high %v731_v7, %v2409_v34 }
 0x221   : > { %v742_v22 = vshrl.u32 %v707_v15, 16 }
 0x222   : > { %v1100_v13 = vsel %vm1095_vm3, %v735_v8, 0  ;;  %v738_v14 = vpack.i.b16 %v737_v11, %v736_v10  ;;  %v743_v17 = vshrl.u32 %v732_v12, 16  ;;  %v741_v18 = vpack.i.b16 %v732_v12, %v707_v15 }
 0x223   : > { %2136 = vmatpush3.bf16.xpose.msra.mxu1 %v1100_v13 }
 0x224   : > { %v1146_v16 = vsel %vm1095_vm3, %v738_v14, 0  ;;  %2147 = vmatprep.subr.bf16.mxu1 %v2401_v0  ;;  %v744_v24 = vpack.i.b16 %v743_v17, %v742_v22  ;;  %v1192_v26 = vsel %vm1095_vm3, %v741_v18, 0 }
 0x225   : > { %2142 = vmatpush3.bf16.xpose.msra.mxu0 %v1146_v16 }
 0x226   : > { %2153 = vmatprep.subr.bf16.mxu0 %v2401_v0  ;;  %v1238_v29 = vsel %vm1095_vm3, %v744_v24, 0 }
 0x22a   : > { %2138 = vmatmul.mubr.msk.bf16.vlgmr.msra.gmra.mrb[0].mxu1 %vm1095_vm3, %v1085_v25 }
 0x22b   : > { %2148 = vmatpush3.bf16.xpose.msra.mxu1 %v1192_v26  ;;  %2149 = vmatprep.mubr.msk.bf16.mxu1 %vm2402_vm0, %v2401_v0 }
 0x22c   : > { %2144 = vmatmul.mubr.msk.bf16.vlgmr.msra.gmra.mrb[4].mxu0 %vm1095_vm3, %v1086_v28  ;;  %2159 = vmatprep.subr.bf16.mxu1 %v2401_v0 }
 0x22d   : > { %2154 = vmatpush3.bf16.xpose.msra.mxu0 %v1238_v29  ;;  %2155 = vmatprep.mubr.msk.bf16.mxu0 %vm2402_vm0, %v2401_v0 }
 0x22e   : > { %2165 = vmatprep.subr.bf16.mxu0 %v2401_v0 }
 0x232   : > { %2150 = vmatmul.mubr.msk.bf16.vlgmr.msra.gmra.mrb[4].mxu1 %vm1095_vm3, %v1087_v30 }
 0x233   : > { %2161 = vmatprep.mubr.msk.bf16.mxu1 %vm2402_vm0, %v2401_v0 }
 0x234   : > { %2156 = vmatmul.mubr.msk.bf16.vlgmr.msra.gmra.mrb[8].mxu0 %vm1095_vm3, %v1088_v31 }
 0x235   : > { %2167 = vmatprep.mubr.msk.bf16.mxu0 %vm2402_vm0, %v2401_v0 }
 0x2fd   : > { %v1136_v33 = vpop.f32.mrb[0].mxu1 }
 0x2fe   : > { %v1137_v35 = vadd.f32 %v2064_v32, %v1136_v33  ;;  %v2139_v36 = vpop.f32.mrb[1].mxu1 }
 0x2ff   : > { %v1139_v37 = vpop.f32.mrb[2].mxu1  ;;  %v1182_v38 = vpop.f32.mrb[4].mxu0 }
 0x300   : > { %v1183_v39 = vadd.f32 %v2064_v32, %v1182_v38  ;;  %v2140_v40 = vpop.f32.mrb[3].mxu1  ;;  %v2145_v41 = vpop.f32.mrb[5].mxu0  ;;  %v1280_v42 = vsel %vm1095_vm3, %v1137_v35, -inf }
 0x301   : > { %1281 = vmax.xlane.f32.xlu1 %v1280_v42  ;;  %v1185_v43 = vpop.f32.mrb[6].mxu0 }
 0x302   : > { %v2146_v44 = vpop.f32.mrb[7].mxu0  ;;  %v1283_v45 = vsel %vm1095_vm3, %v1183_v39, -inf }
 0x303   : > { %1284 = vmax.xlane.f32.xlu0 %v1283_v45 }
 0x305   : > { %v1228_v46 = vpop.f32.mrb[4].mxu1 }
 0x306   : > { %v1229_v47 = vadd.f32 %v2064_v32, %v1228_v46  ;;  %v2151_v48 = vpop.f32.mrb[5].mxu1 }
 0x307   : > { %v1231_v49 = vpop.f32.mrb[6].mxu1  ;;  %v1274_v50 = vpop.f32.mrb[8].mxu0 }
 0x308   : > { %v1275_v51 = vadd.f32 %v2064_v32, %v1274_v50  ;;  %v2152_v52 = vpop.f32.mrb[7].mxu1  ;;  %v2157_v53 = vpop.f32.mrb[9].mxu0  ;;  %v1286_v54 = vsel %vm1095_vm3, %v1229_v47, -inf }
 0x309   : > { %1287 = vmax.xlane.f32.xlu0 %v1286_v54  ;;  %v1277_v55 = vpop.f32.mrb[10].mxu0 }
 0x30a   : > { %v2158_v56 = vpop.f32.mrb[11].mxu0  ;;  %v1289_v57 = vsel %vm1095_vm3, %v1275_v51, -inf }
 0x30b   : > { %1290 = vmax.xlane.f32.xlu1 %v1289_v57 }
 0x31c   : > { %747 = vrot.lane.b32.xlu1 %v2638_v21, %s2410_s23 }
 0x31f   : > { %745 = vrot.lane.b32.xlu0 %v2628_v9, %s2410_s23 }
 0x38e   : > { %v1282_v58 = vpop.xlane.xlu1 %1281 }
 0x38f   : > { %v1292_v59 = vsub.f32 %v1137_v35, %v1282_v58 }
 0x390   : > { %v1285_v60 = vpop.xlane.xlu0 %1284 }
 0x391   : > { %v1296_v61 = vmul.f32 1.442695, %v1292_v59  ;;  %v1293_v62 = vsub.f32 %v1183_v39, %v1285_v60 }
 0x393   : > { %2280 = vpow2.f32 %v1296_v61  ;;  %v1298_v63 = vmul.f32 1.442695, %v1293_v62 }
 0x395   : > { %2282 = vpow2.f32 %v1298_v63 }
 0x396   : > { %v1288_v4 = vpop.xlane.xlu0 %1287 }
 0x397   : > { %v1294_v6 = vsub.f32 %v1229_v47, %v1288_v4 }
 0x398   : > { %v1291_v9 = vpop.xlane.xlu1 %1290 }
 0x399   : > { %v1295_v5 = vsub.f32 %v1275_v51, %v1291_v9  ;;  %v1300_v8 = vmul.f32 1.442695, %v1294_v6 }
 0x39b   : > { %v1302_v7 = vmul.f32 1.442695, %v1295_v5 }
 0x39c   : > { %v748_v13 = vpop.permute.xlu1 %747 }
 0x39d   : > { %v2722_v1 = vpop.eup %2280  ;;  %2284 = vpow2.f32 %v1302_v7  ;;  %v794_v17 = vrot.slane %v748_v13, %v2634_v19 }
 0x39e   : > { %v1304_v2 = vsel %vm1095_vm3, %v2722_v1, 0.0  ;;  %2286 = vpow2.f32 %v1300_v8 }
 0x39f   : > { %v2726_v3 = vpop.eup %2282  ;;  %1305 = vadd.xlane.f32.xlu0 %v1304_v2 }
 0x3a0   : > { %v1307_v21 = vsel %vm1095_vm3, %v2726_v3, 0.0 }
 0x3a1   : > { %1308 = vadd.xlane.f32.xlu1 %v1307_v21 }
 0x3a7   : > { %v2732_v10 = vpop.eup %2284 }
 0x3a8   : > { %v2734_v11 = vpop.eup %2286  ;;  %v1313_v12 = vsel %vm1095_vm3, %v2732_v10, 0.0 }
 0x3b2   : > { %749 = vrot.lane.b32.xlu1 %v2647_v27, %s2410_s23  ;;  %v1310_v27 = vsel %vm1095_vm3, %v2734_v11, 0.0 }
 0x3b5   : > { %751 = vrot.lane.b32.xlu0 %v2636_v20, %s2410_s23  ;;  %v746_v20 = vpop.permute.xlu0 %745  ;;  %s2946_s23 = sld [smem:[#allocation14_spill]] }
 0x3b6   : > { %v760_v24 = vrot.slane %v746_v20, %v2634_v19 }
 0x3bb   : > { %s2867_s0 = scalar_lea.hbm %s2946_s23, %s2094_s29 }
 0x3d4   : > { %1314 = vadd.xlane.f32.xlu0 %v1313_v12 }
 0x3d6   : > { %1311 = vadd.xlane.f32.xlu1 %v1310_v27 }
 0x42c   : > { %v1306_v14 = vpop.xlane.xlu0 %1305 }
 0x42d   : > { %2288 = vrcp.f32 %v1306_v14 }
 0x42e   : > { %v1309_v15 = vpop.xlane.xlu1 %1308 }
 0x42f   : > { %2290 = vrcp.f32 %v1309_v15 }
 0x430   : > { %v752_v16 = vpop.permute.xlu0 %751 }
 0x431   : > { %v802_v18 = vrot.slane %v752_v16, %v2634_v19 }
 0x432   : > { %v750_v22 = vpop.permute.xlu1 %749 }
 0x433   : > { %v803_v25 = vcombine.low %v794_v17, %v802_v18  ;;  %v804_v26 = vcombine.high %v794_v17, %v802_v18  ;;  %v768_v28 = vrot.slane %v750_v22, %v2634_v19 }
 0x435   : > { %v811_v29 = vrot.slane %v803_v25, %v2642_v23  ;;  %v818_v30 = vrot.slane %v804_v26, %v2642_v23  ;;  %v769_v31 = vcombine.low %v760_v24, %v768_v28  ;;  %v770_v32 = vcombine.high %v760_v24, %v768_v28 }
 0x437   : > { %v819_v33 = vcombine.high %v811_v29, %v2409_v34  ;;  %v820_v35 = vcombine.high %v818_v30, %v2409_v34  ;;  %v777_v36 = vrot.slane %v769_v31, %v2642_v23  ;;  %v784_v37 = vrot.slane %v770_v32, %v2642_v23  ;;  %v2289_v62 = vpop.eup %2288 }
 0x438   : > { %v826_v38 = vshrl.u32 %v811_v29, 16  ;;  %v842_v39 = vshrl.u32 %v818_v30, 16  ;;  %v1320_v8 = vmul.f32 %v2289_v62, %v2722_v1 }
 0x439   : > { %v834_v40 = vshrl.u32 %v819_v33, 16  ;;  %v785_v41 = vcombine.high %v777_v36, %v2409_v34  ;;  %v786_v42 = vcombine.high %v784_v37, %v2409_v34  ;;  %v823_v43 = vpack.i.b16 %v811_v29, %v777_v36  ;;  %v2291_v9 = vpop.eup %2290 }
 0x43a   : > { %v850_v44 = vshrl.u32 %v820_v35, 16  ;;  %v825_v45 = vshrl.u32 %v777_v36, 16  ;;  %v839_v46 = vpack.i.b16 %v818_v30, %v784_v37  ;;  %v841_v47 = vshrl.u32 %v784_v37, 16 }
 0x43b   : > { %v831_v48 = vpack.i.b16 %v819_v33, %v785_v41  ;;  %v833_v49 = vshrl.u32 %v785_v41, 16  ;;  %v847_v50 = vpack.i.b16 %v820_v35, %v786_v42  ;;  %v849_v51 = vshrl.u32 %v786_v42, 16 }
 0x43c   : > { %v827_v52 = vpack.i.b16 %v826_v38, %v825_v45  ;;  %v843_v53 = vpack.i.b16 %v842_v39, %v841_v47  ;;  %v853_v54 = vcombine.low %v823_v43, %v839_v46  ;;  %v1321_v14 = vmul.f32 %v2291_v9, %v2726_v3 }
 0x43d   : > { %v835_v55 = vpack.i.b16 %v834_v40, %v833_v49  ;;  %v851_v56 = vpack.i.b16 %v850_v44, %v849_v51  ;;  %v861_v57 = vcombine.low %v831_v48, %v847_v50  ;;  %v1324_v25 = vpack.c.bf16 %v1320_v8, %v1320_v8 }
 0x43e   : > { %v878_v58 = vcombine.low %v827_v52, %v843_v53  ;;  %v860_v59 = vrot.slane %v853_v54, %v2634_v19  ;;  %v1325_v26 = vpack.c.bf16 %v1321_v14, %v1321_v14 }
 0x43f   : > { %v886_v60 = vcombine.low %v835_v55, %v851_v56  ;;  %v868_v61 = vrot.slane %v861_v57, %v2634_v19 }
 0x440   : > { %v885_v2 = vrot.slane %v878_v58, %v2634_v19 }
 0x441   : > { %v869_v63 = vcombine.low %v860_v59, %v868_v61  ;;  %v893_v21 = vrot.slane %v886_v60, %v2634_v19 }
 0x443   : > { %v876_v4 = vrot.slane %v869_v63, %v2642_v23  ;;  %v894_v5 = vcombine.low %v885_v2, %v893_v21  ;;  %v2272_v63 = vld [vmem:[%s2915_s4] sm:$0xff]  }
 0x445   : > { %v901_v6 = vrot.slane %v894_v5, %v2642_v23  ;;  %v877_v7 = vcombine.high %v876_v4, %v2409_v34  ;;  %v906_v27 = vshrl.u32 %v876_v4, 16 }
 0x447   : > { %v905_v12 = vpack.i.b16 %v901_v6, %v876_v4  ;;  %v907_v20 = vshrl.u32 %v901_v6, 16  ;;  %v902_v13 = vcombine.high %v901_v6, %v2409_v34  ;;  %v912_v15 = vshrl.u32 %v877_v7, 16 }
 0x449   : > { %v1333_v16 = vsel %vm1331_vm4, %v905_v12, 0  ;;  %v908_v17 = vpack.i.b16 %v907_v20, %v906_v27  ;;  %v911_v18 = vpack.i.b16 %v902_v13, %v877_v7  ;;  %v913_v22 = vshrl.u32 %v902_v13, 16  ;;  %v2273_v12 = vld [vmem:[%s2915_s4 + $0x8] sm:$0xff]  }
 0x44a   : > { %2160 = vmatpush3.bf16.msra.mxu1 %v1333_v16 }
 0x44b   : > { %v1379_v24 = vsel %vm1331_vm4, %v908_v17, 0  ;;  %2171 = vmatprep.subr.bf16.mxu1 %v2401_v0  ;;  %v914_v1 = vpack.i.b16 %v913_v22, %v912_v15  ;;  %v1425_v34 = vsel %vm1331_vm4, %v911_v18, 0 }
 0x44c   : > { %2166 = vmatpush3.bf16.msra.mxu0 %v1379_v24 }
 0x44d   : > { %2162 = vmatmul.mubr.msk.bf16.vlgmr.msra.gmra.mrb[8].mxu1 %vm1095_vm3, %v1324_v25  ;;  %2177 = vmatprep.subr.bf16.mxu0 %v2401_v0  ;;  %v1471_v3 = vsel %vm1331_vm4, %v914_v1, 0 }
 0x44e   : > { %2172 = vmatpush3.bf16.msra.mxu1 %v1425_v34  ;;  %2173 = vmatprep.mubr.msk.bf16.mxu1 %vm2402_vm0, %v2401_v0 }
 0x44f   : > { %2168 = vmatmul.mubr.msk.bf16.vlgmr.msra.gmra.mrb[12].mxu0 %vm1095_vm3, %v1325_v26  ;;  %2183 = vmatprep.subr.bf16.mxu1 %v2401_v0 }
 0x450   : > { %2178 = vmatpush3.bf16.msra.mxu0 %v1471_v3  ;;  %2179 = vmatprep.mubr.msk.bf16.mxu0 %vm2402_vm0, %v2401_v0 }
 0x451   : > { %2191 = vmatprep.subr.bf16.mxu0 %v2401_v0 }
 0x461   : > { %v1315_v28 = vpop.xlane.xlu0 %1314 }
 0x462   : > { %2292 = vrcp.f32 %v1315_v28 }
 0x463   : > { %v1312_v29 = vpop.xlane.xlu1 %1311 }
 0x464   : > { %2294 = vrcp.f32 %v1312_v29 }
 0x46c   : > { %v2293_v30 = vpop.eup %2292 }
 0x46d   : > { %v1323_v31 = vmul.f32 %v2293_v30, %v2732_v10 }
 0x46e   : > { %v2295_v32 = vpop.eup %2294 }
 0x46f   : > { %v1322_v33 = vmul.f32 %v2295_v32, %v2734_v11  ;;  %v1327_v35 = vpack.c.bf16 %v1323_v31, %v1323_v31 }
 0x471   : > { %2180 = vmatmul.mubr.msk.bf16.vlgmr.msra.gmra.mrb[16].mxu0 %vm1095_vm3, %v1327_v35  ;;  %v1326_v36 = vpack.c.bf16 %v1322_v33, %v1322_v33  ;;  %v1733_v35 = vld [vmem:[%s2601_s14] sm:$0xf]  ;;  %s1960_s14 = scalar_lea.sflag [#allocation5], %s2595_s28 }
 0x472   : > { %2195 = vmatprep.mubr.msk.bf16.mxu0 %vm2402_vm0, %v2401_v0 }
 0x473   : > { %2174 = vmatmul.mubr.msk.bf16.vlgmr.msra.gmra.mrb[12].mxu1 %vm1095_vm3, %v1326_v36  ;;  %v2075_v36 = vld [vmem:[%s2916_s5] ss:$0 sm:$0xff] }
 0x474   : > { %2187 = vmatprep.mubr.msk.bf16.mxu1 %vm2402_vm0, %v2401_v0  ;;  %2184 = vmatpush3.bf16.msra.mxu1 %v2272_v63  ;;  %v2279_v63 = vld [vmem:[%s2921_s10 + $0x18] sm:$0xff]  }
 0x475   : > { %2185 = vmatprep.subr.bf16.mxu1 %v2401_v0 }
 0x478   : > { %2186 = vmatpush3.bf16.msra.mxu1 %v2273_v12 }
 0x479   : > { %2199 = vmatprep.subr.bf16.mxu1 %v2401_v0 }
 0x520   : > { %v1369_v37 = vpop.f32.mrb[8].mxu1 }
 0x521   : > { %v2163_v38 = vpop.f32.mrb[9].mxu1 }
 0x522   : > { %v1372_v39 = vpop.f32.mrb[10].mxu1  ;;  %v1415_v40 = vpop.f32.mrb[12].mxu0 }
 0x523   : > { %v2164_v10 = vpop.f32.mrb[11].mxu1  ;;  %v2169_v41 = vpop.f32.mrb[13].mxu0 }
 0x524   : > { %v1418_v42 = vpop.f32.mrb[14].mxu0 }
 0x525   : > { %v2170_v11 = vpop.f32.mrb[15].mxu0 }
 0x544   : > { %v1507_v43 = vpop.f32.mrb[16].mxu0 }
 0x545   : > { %v1529_v44 = vcombine.low %v1415_v40, %v1507_v43  ;;  %v1530_v45 = vcombine.high %v1415_v40, %v1507_v43  ;;  %v2181_v46 = vpop.f32.mrb[17].mxu0 }
 0x546   : > { %v1461_v47 = vpop.f32.mrb[12].mxu1  ;;  %v1510_v48 = vpop.f32.mrb[18].mxu0 }
 0x547   : > { %v1513_v49 = vcombine.low %v1369_v37, %v1461_v47  ;;  %v1514_v50 = vcombine.high %v1369_v37, %v1461_v47  ;;  %v2175_v51 = vpop.f32.mrb[13].mxu1  ;;  %v2182_v52 = vpop.f32.mrb[19].mxu0  ;;  %v1537_v54 = vrot.slane %v1529_v44, %v2634_v19  ;;  %v1544_v55 = vrot.slane %v1530_v45, %v2634_v19  ;;  %v2274_v48 = vld [vmem:[%s2919_s8] sm:$0xff]  }
 0x548   : > { %v1464_v53 = vpop.f32.mrb[14].mxu1  ;;  %v1734_v37 = vunpack.c.l.bf16 %v1733_v35  ;;  %2192 = vmatpush3.bf16.msra.mxu0 %v2274_v48  ;;  %v2091_v35 = vld [vmem:[%s2923_s12] ss:$0 sm:$0xff] }
 0x549   : > { %v1521_v56 = vrot.slane %v1513_v49, %v2634_v19  ;;  %v1528_v57 = vrot.slane %v1514_v50, %v2634_v19  ;;  %v2176_v58 = vpop.f32.mrb[15].mxu1  ;;  %v2275_v49 = vld [vmem:[%s2919_s8 + $0x8] sm:$0xff]   ;;  %2193 = vmatprep.subr.bf16.mxu0 %v2401_v0 }
 0x54b   : > { %v1545_v59 = vcombine.low %v1521_v56, %v1537_v54  ;;  %v1546_v60 = vcombine.high %v1521_v56, %v1537_v54  ;;  %v1561_v61 = vcombine.low %v1528_v57, %v1544_v55  ;;  %v1562_v62 = vcombine.high %v1528_v57, %v1544_v55  ;;  %v2079_v54 = vld [vmem:[%s2917_s6] ss:$0 sm:$0xff] }
 0x54c   : > { %2194 = vmatpush3.bf16.msra.mxu0 %v2275_v49  ;;  %v2080_v56 = vld [vmem:[%s2918_s7] ss:$0 sm:$0xff] }
 0x54d   : > { %v1553_v2 = vrot.slane %v1545_v59, %v2642_v23  ;;  %v1560_v21 = vrot.slane %v1546_v60, %v2642_v23  ;;  %v1569_v9 = vrot.slane %v1561_v61, %v2642_v23  ;;  %v1576_v4 = vrot.slane %v1562_v62, %v2642_v23  ;;  %v2276_v60 = vld [vmem:[%s2921_s10] sm:$0xff]   ;;  %v2277_v61 = vld [vmem:[%s2921_s10 + $0x8] sm:$0xff]   ;;  %v2278_v62 = vld [vmem:[%s2921_s10 + $0x10] sm:$0xff]  }
 0x54f   : > { %v1581_v5 = vcombine.low %v1553_v2, %v1560_v21  ;;  %v2073_v6 = vcombine.high %v1553_v2, %v1560_v21  ;;  %v1597_v7 = vcombine.low %v1569_v9, %v1576_v4  ;;  %v2074_v8 = vcombine.high %v1569_v9, %v1576_v4  ;;  %v2081_v2 = vld [vmem:[%s2920_s9] ss:$0 sm:$0xff] }
 0x551   : > { %v1588_v27 = vrot.slane %v1581_v5, %v2634_v19  ;;  %v1596_v20 = vrot.slane %v2073_v6, %v2634_v19  ;;  %v1604_v13 = vrot.slane %v1597_v7, %v2634_v19  ;;  %v1612_v14 = vrot.slane %v2074_v8, %v2634_v19 }
 0x553   : > { %v1614_v15 = vcombine.high %v1588_v27, %v1596_v20  ;;  %v1630_v16 = vcombine.high %v1604_v13, %v1612_v14  ;;  %v1613_v17 = vcombine.low %v1588_v27, %v1596_v20  ;;  %v1629_v18 = vcombine.low %v1604_v13, %v1612_v14 }
 0x555   : > { %v1628_v22 = vrot.slane %v1614_v15, %v2642_v23  ;;  %v1644_v24 = vrot.slane %v1630_v16, %v2642_v23  ;;  %v1621_v25 = vrot.slane %v1613_v17, %v2642_v23  ;;  %v1637_v1 = vrot.slane %v1629_v18, %v2642_v23  ;;  %v2085_v17 = vld [vmem:[%s2922_s11] ss:$0 sm:$0xff] }
 0x557   : > { %v1647_v34 = vcombine.low %v1628_v22, %v1644_v24  ;;  %v1646_v26 = vcombine.high %v1621_v25, %v1637_v1  ;;  %v1648_v3 = vcombine.high %v1628_v22, %v1644_v24  ;;  %v1645_v28 = vcombine.low %v1621_v25, %v1637_v1 }
 0x559   : > { %1654 = vrot.lane.b32.xlu1 %v1647_v34, %s2411_s19  ;;  %1650 = vrot.lane.b32.xlu0 %v1646_v26, %s2412_s24  ;;  %s493_s19 = scalar_lea.vmem [#allocation6], %s2058_s21  ;;  %s2336_s21 = sshll.u32 %s2414_s17, 4  ;;  %s2337_s21 = int_to_ptr.vmem [resolvable:$false] %s2336_s21 }
 0x55a   : > { %s1973_s24 = sshll.u32 %s493_s19, 4  ;;  %s2338_s15 = scalar_lea.vmem %s2337_s21, 128  ;;  %s2869_s24 = int_to_ptr.vmem [resolvable:$true] %s1973_s24 }
 0x55b   : > { %s2332_s20 = scalar_lea.vmem %s2869_s24, 64  ;;  %p2339_p10 = scmp.lt.s32.totalorder %s2869_s24, %s2337_s21 }
 0x55c   : > { %p2333_p11 = scmp.ne.s32.totalorder %s2869_s24, %s2332_s20  ;;  %p2340_p2 = scmp.lt.s32.totalorder %s2338_s15, %s2332_s20 }
 0x55d   : > { %1658 = vrot.lane.b32.xlu1 %v1648_v3, %s2413_s22 }
 0x55e   : > { %p2334_p13 = pnand %p2333_p11, %p2947_p12  ;;  %p2341_p4 = por %p2340_p2, %p2339_p10 }
 0x560   : > { %p2335_p7 = pneg %p2334_p13 }
 0x562   : > { %p2342_p5 = pnand %p2341_p4, %p2335_p7 }
 0x5cb   : > { %v1655_v19 = vpop.permute.xlu1 %1654  ;;  %v1651_v29 = vpop.permute.xlu0 %1650 }
 0x5cc   : > { %v1661_v30 = vsel %vm1095_vm3, %v1645_v28, %v1651_v29 }
 0x5cd   : > { %v1663_v32 = vsel %vm1662_vm5, %v1661_v30, %v1655_v19 }
 0x5cf   : > { %v1659_v31 = vpop.permute.xlu1 %1658 }
 0x5d0   : > { %v1665_v23 = vsel %vm1664_vm6, %v1663_v32, %v1659_v31 }
 0x5d1   : > { %v1666_v33 = vpack.c.bf16 %v1665_v23, %v1665_v23 }
 0x5d3   : > { %2188 = vmatmul.mubr.msk.bf16.vlgmr.msra.gmra.mrb[16].mxu1 %vm523_vm1, %v1666_v33 }
 0x5d4   : > { %2207 = vmatprep.mubr.msk.bf16.mxu1 %vm2402_vm0, %v2401_v0  ;;  %2200 = vmatpush3.bf16.msra.mxu1 %v2276_v60 }
 0x5d5   : > { %2201 = vmatprep.subr.bf16.mxu1 %v2401_v0 }
 0x5d8   : > { %2202 = vmatpush3.bf16.msra.mxu1 %v2277_v61 }
 0x5d9   : > { %2203 = vmatprep.subr.bf16.mxu1 %v2401_v0 }
 0x5dc   : > { %2204 = vmatpush3.bf16.msra.mxu1 %v2278_v62 }
 0x5dd   : > { %2205 = vmatprep.subr.bf16.mxu1 %v2401_v0 }
 0x5e0   : > { %2206 = vmatpush3.bf16.msra.mxu1 %v2279_v63 }
 0x6a6   : > { %v1727_v38 = vpop.f32.mrb[16].mxu1 }
 0x6a7   : > { %v1728_v39 = vadd.f32 %v2075_v36, %v1727_v38  ;;  %v2189_v40 = vpop.f32.mrb[17].mxu1 }
 0x6a8   : > { %v1730_v10 = vpop.f32.mrb[18].mxu1 }
 0x6a9   : > { %v2190_v41 = vpop.f32.mrb[19].mxu1  ;;  %v1735_v42 = vadd.f32 %v1734_v37, %v1728_v39  ;;  %v2092_v37 = vld [vmem:[%s2924_s13] ss:$0 sm:$0xff] }
 0x6ab   : > { %v1738_v11 = vsel %vm523_vm1, %v1735_v42, 0.0 }
 0x6ac   : > { %1739 = vadd.xlane.f32.xlu0 %v1738_v11 }
 0x739   : > { %v1740_v43 = vpop.xlane.xlu0 %1739 }
 0x73a   : > { %v1742_v44 = vmul.f32 0.03125, %v1740_v43 }
 0x73c   : > { %v1743_v45 = vsub.f32 %v1735_v42, %v1742_v44 }
 0x73e   : > { %v1744_v46 = vmul.f32 %v1743_v45, %v1743_v45 }
 0x740   : > { %v1745_v47 = vsel %vm523_vm1, %v1744_v46, 0.0 }
 0x741   : > { %1746 = vadd.xlane.f32.xlu1 %v1745_v47 }
 0x7ce   : > { %v1747_v50 = vpop.xlane.xlu1 %1746 }
 0x7cf   : > { %v1748_v51 = vmul.f32 0.03125, %v1747_v50 }
 0x7d1   : > { %v1749_v52 = vadd.f32 1e-12, %v1748_v51 }
 0x7d3   : > { %2296 = vrsqrt.f32 %v1749_v52 }
 0x7dd   : > { %v2297_v53 = vpop.eup %2296 }
 0x7de   : > { %v1751_v55 = vmul.f32 %v2297_v53, %v1743_v45 }
 0x7e0   : > { %v1758_v57 = vmul.f32 %v2079_v54, %v1751_v55 }
 0x7e2   : > { %v1765_v58 = vadd.f32 %v2080_v56, %v1758_v57 }
 0x7e4   : > { %v1766_v59 = vpack.c.bf16 %v1765_v58, %v1765_v58 }
 0x7e6   : > { %2196 = vmatmul.mubr.msk.bf16.vlgmr.msra.gmra.mrb[20].mxu0 %vm523_vm1, %v1766_v59 }
 0x8b9   : > { %v1827_v21 = vpop.f32.mrb[20].mxu0 }
 0x8ba   : > { %v1828_v9 = vadd.f32 %v2081_v2, %v1827_v21  ;;  %v2197_v4 = vpop.f32.mrb[21].mxu0 }
 0x8bb   : > { %v1830_v5 = vpop.f32.mrb[22].mxu0 }
 0x8bc   : > { %v1834_v6 = vmul.f32 %v1828_v9, %v1828_v9  ;;  %v2198_v7 = vpop.f32.mrb[23].mxu0  ;;  %v1833_v13 = vmul.f32 0.5, %v1828_v9 }
 0x8be   : > { %v1835_v8 = vmul.f32 %v1834_v6, %v1828_v9 }
 0x8c0   : > { %v1836_v12 = vmul.f32 0.044715, %v1835_v8 }
 0x8c2   : > { %v1837_v27 = vadd.f32 %v1836_v12, %v1828_v9 }
 0x8c4   : > { %v1838_v20 = vmul.f32 0.7978846, %v1837_v27 }
 0x8c6   : > { %2298 = vtanh.f32 %v1838_v20 }
 0x8d0   : > { %v2299_v0 = vpop.eup %2298 }
 0x8d1   : > { %v1840_v14 = vadd.f32 1.0, %v2299_v0 }
 0x8d3   : > { %v1841_v15 = vmul.f32 %v1840_v14, %v1833_v13 }
 0x8d5   : > { %v1842_v16 = vpack.c.bf16 %v1841_v15, %v1841_v15 }
 0x8d7   : > { %2208 = vmatmul.mubr.msk.bf16.vlgmr.msra.gmra.mrb[20].mxu1 %vm1882_vm7, %v1842_v16 }
 0x9aa   : > { %v1920_v18 = vpop.f32.mrb[20].mxu1 }
 0x9ab   : > { %v1921_v22 = vadd.f32 %v2085_v17, %v1920_v18  ;;  %v2209_v24 = vpop.f32.mrb[21].mxu1 }
 0x9ac   : > { %v1923_v25 = vpop.f32.mrb[22].mxu1 }
 0x9ad   : > { %v2210_v1 = vpop.f32.mrb[23].mxu1  ;;  %v1926_v34 = vadd.f32 %v1921_v22, %v1765_v58 }
 0x9af   : > { %v1929_v26 = vsel %vm523_vm1, %v1926_v34, 0.0 }
 0x9b0   : > { %1930 = vadd.xlane.f32.xlu0 %v1929_v26 }
 0xa3d   : > { %v1931_v3 = vpop.xlane.xlu0 %1930 }
 0xa3e   : > { %v1932_v28 = vmul.f32 0.03125, %v1931_v3 }
 0xa40   : > { %v1933_v19 = vsub.f32 %v1926_v34, %v1932_v28 }
 0xa42   : > { %v1934_v29 = vmul.f32 %v1933_v19, %v1933_v19 }
 0xa44   : > { %v1935_v30 = vsel %vm523_vm1, %v1934_v29, 0.0 }
 0xa45   : > { %1936 = vadd.xlane.f32.xlu0 %v1935_v30 }
 0xad2   : > { %v1937_v31 = vpop.xlane.xlu0 %1936 }
 0xad3   : > { %v1938_v32 = vmul.f32 0.03125, %v1937_v31 }
 0xad5   : > { %v1939_v23 = vadd.f32 1e-12, %v1938_v32 }
 0xad7   : > { %2300 = vrsqrt.f32 %v1939_v23 }
 0xae1   : > { %v2301_v33 = vpop.eup %2300 }
 0xae2   : > { %v1941_v36 = vmul.f32 %v2301_v33, %v1933_v19 }
 0xae4   : > { %v1948_v38 = vmul.f32 %v2091_v35, %v1941_v36 }
 0xae6   : > { %v1955_v39 = vadd.f32 %v2092_v37, %v1948_v38 }
 0xae8   : > { %v1956_v40 = vpack.c.bf16 %v1955_v39, %v1955_v39 }
 0xaea   : > { %1958 = vst.msk [vmem:[%s493_s19] sm:$0xf] %vm1957_vm8, %v1956_v40 }
 0xaeb   : > { %2345 = shalt.err (!%p2342_p5)
}
 0xaec   : > { %s2346_s28 = scalar_lea.hbm %s2867_s0, 64  ;;  %s2350_s19 = scalar_lea.hbm %s2946_s23, 128 }
 0xaed   : > { %p2347_p8 = scmp.ne.s32.totalorder %s2867_s0, %s2346_s28  ;;  %p2351_p1 = scmp.lt.u32.totalorder %s2867_s0, %s2946_s23 }
 0xaee   : > { %p2352_p3 = scmp.lt.u32.totalorder %s2350_s19, %s2346_s28  ;;  %p2354_p11 = scmp.lt.u32.totalorder %s2346_s28, %s2867_s0 }
 0xaef   : > { %p2348_p9 = pnand %p2347_p8, %p2947_p12 }
 0xaf0   : > { %p2353_p6 = por %p2352_p3, %p2351_p1 }
 0xaf1   : > { %p2349_p0 = pneg %p2348_p9 }
 0xaf2   : > { %p2355_p13 = por %p2354_p11, %p2353_p6 }
 0xaf4   : > { %p2356_p7 = pnand %p2355_p13, %p2349_p0 }
 0xaf6   : > { %2359 = shalt.err (!%p2356_p7)
}
 0xaf7   : > { %2213 = dma.vmem_to_hbm [thread:$0]  (%p2947_p12), %s2869_s24, 64, %s2867_s0, %s1960_s14  }
 0xaf8 PF: > { %s2948_s20 = sld [smem:[#allocation9_spill]]  ;;  %p2949_p10 = scmp.ne.s32.totalorder %s2941_s26, 0 }
 0xaf9   : > { %p2950_p2 = scmp.ge.s32.totalorder %s2398_s16, 2 }
 0xafb   : > { %p2220_p4 = pnand %p2950_p2, %p2949_p10 }
 0xafe   : > { %s1985_s17 = sand.u32 1, %s2948_s20  }
 0xaff   : > { %s1986_s21 = scalar_lea.sflag [#allocation5], %s1985_s17 }
 0xb00   : > { %2381 = dma.done.wait (!%p2220_p4), %s1986_s21, 64  }
 0xb01   : > { %2383 = vsyncadd (!%p2220_p4), %s1986_s21, 4294967232  ;;  %s2951_s16 = sld [smem:[#allocation11_spill]]  ;;  %s2952_s15 = sld [smem:[#allocation10_spill]] }
 0xb02   : > { %s2953_s28 = sld [smem:[#allocation12_spill]]  ;;  %s2954_s29 = smov %s2390_s30 }
 0xb07   : > { %p27_p5 = scmp.ge.s32.totalorder %s2951_s16, 4   ;;  %s2955_s30 = smov %s2952_s15 }
 0xb08   : > { %s2956_s15 = smov %s2953_s28 }
 0xb09   :  { %29 = sbr.rel (!%p27_p5) target bundleno = 8 (0x8), region = 124 }
 0xb10   :  { %1991 = vsyncpa [#allocation4], 1 }
 0xb11   :  { %1993 = vsyncpa [#allocation4 + $0x1], 1 }
 0xb12   :  { %1994 = vsyncpa [#allocation5], 1 }
 0xb13   :  { %1996 = vsyncpa [#allocation5 + $0x1], 1 }

// kernel: tpu_custom_call.1
= control target key start
LH: loop header
LB: loop body
LE: loop exit
PB: predicated region body
PF: predicated region fallthrough
CT: control target
= control target key end

     0   :  { %s2911_s0 = inlined_call_operand.hbm [shape: bf16[2,8,32], index: 0, kind: input, shape index: {}]   ;;  %s2912_s1 = inlined_call_operand.vmem [shape: f32[2,1,8], index: 1, kind: input, shape index: {}]   ;;  %s2913_s2 = inlined_call_operand.vmem [shape: bf16[32,96], index: 2, kind: input, shape index: {}]   ;;  %s2914_s3 = inlined_call_operand.vmem [shape: f32[1,96], index: 3, kind: input, shape index: {}]   ;;  %s2915_s4 = inlined_call_operand.vmem [shape: bf16[32,32], index: 4, kind: input, shape index: {}]   ;;  %s2916_s5 = inlined_call_operand.vmem [shape: f32[1,32], index: 5, kind: input, shape index: {}]   ;;  %s2917_s6 = inlined_call_operand.vmem [shape: f32[1,32], index: 6, kind: input, shape index: {}]   ;;  %s2918_s7 = inlined_call_operand.vmem [shape: f32[1,32], index: 7, kind: input, shape index: {}]   ;;  %s2919_s8 = inlined_call_operand.vmem [shape: bf16[32,64], index: 8, kind: input, shape index: {}]   ;;  %s2920_s9 = inlined_call_operand.vmem [shape: f32[1,64], index: 9, kind: input, shape index: {}]   ;;  %s2921_s10 = inlined_call_operand.vmem [shape: bf16[64,32], index: 10, kind: input, shape index: {}]   ;;  %s2922_s11 = inlined_call_operand.vmem [shape: f32[1,32], index: 11, kind: input, shape index: {}]   ;;  %s2923_s12 = inlined_call_operand.vmem [shape: f32[1,32], index: 12, kind: input, shape index: {}]   ;;  %s2924_s13 = inlined_call_operand.vmem [shape: f32[1,32], index: 13, kind: input, shape index: {}]   ;;  %s2925_s14 = inlined_call_operand.hbm [shape: bf16[2,8,32], index: 14, kind: output, shape index: {}]  }
   0x1   :  { %2932 = sst [smem:[#allocation13_spill]] %s2911_s0 }
   0x2   :  { %2933 = sst [smem:[#allocation14_spill]] %s2925_s14 }
   0x3   :  { %19 = vsyncpa [#allocation4], 0 }
   0x4   :  { %21 = vsyncpa [#allocation4 + $0x1], 0 }
   0x5   :  { %22 = vsyncpa [#allocation5], 0 }
   0x6   :  { %24 = vsyncpa [#allocation5 + $0x1], 0  ;;  %s2490_s29 = smov 0   ;;  %s2492_s30 = smov 0  }
   0x7   :  { %s2494_s15 = smov 0   ;;  %s2496_s16 = smov 0  }
   0x8 LB: > { %2934 = sst [smem:[#allocation9_spill]] %s2386_s29  ;;  %s2511_s17 = sadd.s32 4294967295, %s2398_s16   ;;  %s2398_s16 = sphi %s2496_s16, %s2951_s16   ;;  %s2394_s15 = sphi %s2494_s15, %s2956_s15   ;;  %s2390_s30 = sphi %s2492_s30, %s2955_s30   ;;  %s2386_s29 = sphi %s2490_s29, %s2954_s29  }
   0x9   : > { %2935 = sst [smem:[#allocation10_spill]] %s2394_s15  ;;  %s2052_s18 = sadd.s32 4294967294, %s2398_s16  }
   0xa   : > { %s2515_s19 = sadd.s32 1, %s2398_s16   ;;  %s37_s20 = sadd.s32 1, %s2394_s15 }
   0xb   : > { %2936 = sst [smem:[#allocation11_spill]] %s2515_s19  ;;  %s34_s21 = ssub.s32 %s2398_s16, %s2515_s19 }
   0xc   : > { %p44_p0 = scmp.ne.s32.totalorder %s2394_s15, %s2390_s30  ;;  %p35_p1 = scmp.eq.s32.totalorder %s34_s21, 0 }
   0xd   : > { %p45_p2 = scmp.eq.s32.totalorder %s2398_s16, 0  ;;  %p50_p3 = scmp.ne.s32.totalorder %s2390_s30, %s2386_s29 }
   0xe   : > { %p51_p4 = scmp.eq.s32.totalorder %s2511_s17, 0  ;;  %p352_p7 = scmp.eq.s32.totalorder %s2511_s17, 1 }
   0xf   : > { %s2527_s22 = scalar_select %p35_p1, %s2394_s15, %s37_s20  }
  0x10   : > { %p2529_p5 = por %p45_p2, %p44_p0  ;;  %p2533_p6 = por %p51_p4, %p50_p3 }
  0x11   : > { %2937 = sst [smem:[#allocation12_spill]] %s2527_s22  ;;  %p358_p8 = scmp.eq.s32.totalorder %s2052_s18, 1 }
  0x12   : > { %p2223_p10 = scmp.lt.s32.totalorder %s2398_s16, 2  ;;  %p2540_p11 = por %p352_p7, %p44_p0 }
  0x13   : > { %p2544_p12 = por %p358_p8, %p50_p3  ;;  %s414_s27 = sand.u32 1, %s2394_s15  }
  0x14   : > { %s2940_s25 = scalar_select %p2540_p11, 1, 0 }
  0x15   : > { %s2941_s26 = scalar_select %p2544_p12, 1, 0 }
  0x16   : > { %s2056_s28 = sshll.u32 %s2398_s16, 6  ;;  %s2055_s20 = sshll.u32 %s414_s27, 2 }
  0x17   : > { %s2942_s0 = sld [smem:[#allocation13_spill]]  ;;  %s418_s18 = scalar_lea.vmem [#allocation3], %s2055_s20 }
  0x18   : > { %s425_s29 = sshll.u32 %s418_s18, 4  ;;  %p2557_p13 = pnand %p2223_p10, %p2529_p5  ;;  %s2561_s29 = int_to_ptr.vmem [resolvable:$true] %s425_s29 }
  0x19   : > { %s415_s22 = scalar_lea.sflag [#allocation4], %s414_s27 }
  0x1a   : > { %p2304_p3 = pneg %p2557_p13 }
  0x1d   : > { %s2553_s19 = scalar_lea.hbm %s2942_s0, %s2056_s28  ;;  %s2307_s21 = scalar_lea.hbm %s2942_s0, 128 }
  0x1e   : > { %s2302_s28 = scalar_lea.hbm %s2553_s19, 64  ;;  %p2308_p5 = scmp.lt.u32.totalorder %s2553_s19, %s2942_s0 }
  0x1f   : > { %p2303_p2 = scmp.ne.s32.totalorder %s2553_s19, %s2302_s28  ;;  %p2309_p8 = scmp.lt.u32.totalorder %s2307_s21, %s2302_s28 }
  0x20   : > { %p2311_p9 = scmp.lt.u32.totalorder %s2302_s28, %s2553_s19 }
  0x21   : > { %p2305_p4 = pnand %p2304_p3, %p2303_p2  ;;  %p2310_p10 = por %p2309_p8, %p2308_p5 }
  0x23   : > { %p2306_p7 = pneg %p2305_p4  ;;  %p2312_p0 = por %p2311_p9, %p2310_p10 }
  0x25   : > { %p2313_p1 = pnand %p2312_p0, %p2306_p7 }
  0x27   : > { %2316 = shalt.err (!%p2313_p1)
}
  0x28   : > { %s2317_s27 = scalar_lea.vmem %s2561_s29, 64  ;;  %s2400_s23 = smov [#allocation3]  }
  0x29   : > { %p2318_p2 = scmp.ne.s32.totalorder %s2561_s29, %s2317_s27  ;;  %s2322_s20 = sshll.u32 %s2400_s23, 4  ;;  %s2323_s20 = int_to_ptr.vmem [resolvable:$false] %s2322_s20 }
  0x2a   : > { %s2324_s15 = scalar_lea.vmem %s2323_s20, 128  ;;  %p2325_p11 = scmp.lt.s32.totalorder %s2561_s29, %s2323_s20 }
  0x2b   : > { %p2320_p4 = pnand %p2318_p2, %p2304_p3  ;;  %p2326_p5 = scmp.lt.s32.totalorder %s2324_s15, %s2317_s27 }
  0x2d   : > { %p2321_p12 = pneg %p2320_p4  ;;  %p2327_p8 = por %p2326_p5, %p2325_p11 }
  0x2f   : > { %p2328_p9 = pnand %p2327_p8, %p2321_p12 }
  0x31   : > { %2331 = shalt.err (!%p2328_p9)
}
  0x32   : > { %2218 = dma.hbm_to_vmem [thread:$0]  (!%p2557_p13), %s2553_s19, 64, %s2561_s29, %s415_s22  }
  0x33   : > { %p2944_p0 = scmp.lt.s32.totalorder %s2398_s16, 3  ;;  %p2945_p1 = scmp.ge.s32.totalorder %s2398_s16, 1 }
  0x35   : > { %p437_p3 = pnand %p2945_p1, %p2944_p0 }
  0x36   : > { %s2595_s28 = sand.u32 (!%p437_p3), 1, %s2390_s30  }
  0x37   : > { %440 = sbr.rel (%p437_p3) target bundleno = 2808 (0xaf8), region = 76  ;;  %s2058_s21 = sshll.u32 (!%p437_p3), %s2595_s28, 2 }
  0x38   : > { %s443_s18 = scalar_lea.sflag (!%p437_p3), [#allocation4], %s2595_s28  ;;  %s2601_s14 = scalar_lea.vmem (!%p437_p3), [#allocation3], %s2058_s21 }
  0x3e   : > { %2377 = dma.done.wait (%p2533_p6), %s443_s18, 64  }
  0x3f   : > { %2379 = vsyncadd (%p2533_p6), %s443_s18, 4294967232  ;;  %v2401_v0 = vmov 0.0   ;;  %vm2402_vm0 = vmmov 0   ;;  %v2270_v1 = vld [vmem:[%s2913_s2] sm:$0xff]   ;;  %v2271_v2 = vld [vmem:[%s2913_s2 + $0x8] sm:$0xff]   ;;  %vm523_vm1 = vcmask 261120   ;;  %v587_v13 = vlaneseq }
  0x40   : > { %2127 = vmatprep.subr.bf16.mxu0 %v2401_v0  ;;  %2131 = vmatprep.mubr.msk.bf16.mxu0 %vm2402_vm0, %v2401_v0  ;;  %v498_v3 = vld [vmem:[%s2601_s14] sm:$0xf]  ;;  %v2060_v4 = vld [vmem:[%s2914_s3] ss:$0 sm:$0xff]  ;;  %s2403_s20 = smov 104   ;;  %s2404_s15 = smov 120  }
  0x41   : > { %2135 = vmatprep.subr.bf16.mxu1 %v2401_v0  ;;  %2137 = vmatprep.mubr.msk.bf16.mxu1 %vm2402_vm0, %v2401_v0  ;;  %s2405_s18 = smov 96   ;;  %s2406_s29 = smov 112   ;;  %v2407_v11 = vmov 1983009808   ;;  %v2408_v14 = vmov 1934713408  }
  0x42   : > { %2128 = vmatpush3.bf16.msra.mxu0 %v2270_v1  ;;  %v585_v12 = vunpack.c.l.s4 %v2407_v11  ;;  %v602_v15 = vunpack.c.l.s4 %v2408_v14  ;;  %v588_v17 = vshrl.u32 %v587_v13, 7  ;;  %v2409_v34 = vmov 0   ;;  %p494_p6 = scmp.lt.s32.totalorder %s2511_s17, 1  ;;  %s2410_s23 = smov 64  }
  0x43   : > { %2129 = vmatprep.subr.bf16.mxu0 %v2401_v0  ;;  %vm1080_vm2 = vcmask 60416   ;;  %vm1095_vm3 = vcmask 64512   ;;  %vm1331_vm4 = vcmask 1043456   ;;  %s2412_s24 = smov 8   ;;  %s2413_s22 = smov 24   ;;  %vm1662_vm5 = vcmask 130048  }
  0x44   : > { %v586_v16 = vunpack.c.0.s8 %v585_v12  ;;  %v603_v18 = vunpack.c.0.s8 %v602_v15  ;;  %s495_s19 = scalar_select %p494_p6, %s2511_s17, 1  ;;  %vm1664_vm6 = vcmask 195584   ;;  %vm1882_vm7 = vcmask 523264  }
  0x45   : > { %vm1957_vm8 = vcmask 257024   ;;  %p2947_p12 = scmp.ne.s32.totalorder %s2940_s25, 0 }
  0x46   : > { %2130 = vmatpush3.bf16.msra.mxu0 %v2271_v2  ;;  %v2634_v19 = vsub.s32 %v586_v16, %v588_v17  ;;  %v2642_v23 = vsub.s32 %v603_v18, %v588_v17  ;;  %s496_s27 = scalar_lea.vmem %s2912_s1, %s495_s19  ;;  %s2411_s19 = smov 16  }
  0x47   : > { %2141 = vmatprep.subr.bf16.mxu0 %v2401_v0 }
  0x49   : > { %2132 = vmatmul.mubr.msk.bf16.vlgmr.msra.gmra.mrb[0].mxu0 %vm523_vm1, %v498_v3 }
  0x4a   : > { %2143 = vmatprep.mubr.msk.bf16.mxu0 %vm2402_vm0, %v2401_v0 }
 0x11c   : > { %v561_v5 = vpop.f32.mrb[0].mxu0 }
 0x11d   : > { %v562_v6 = vadd.f32 %v2060_v4, %v561_v5  ;;  %v2133_v7 = vpop.f32.mrb[1].mxu0 }
 0x11e   : > { %v564_v8 = vpop.f32.mrb[2].mxu0 }
 0x11f   : > { %v2628_v9 = vpack.c.bf16 %v562_v6, %v562_v6  ;;  %v2134_v10 = vpop.f32.mrb[3].mxu0 }
 0x121   : > { %573 = vrot.lane.b32.xlu1 %v2628_v9, %s2403_s20  ;;  %569 = vrot.lane.b32.xlu0 %v2628_v9, %s2404_s15  ;;  %v921_v30 = vrot.slane %v2628_v9, %v2634_v19 }
 0x125   : > { %575 = vrot.lane.b32.xlu1 %v2628_v9, %s2405_s18  ;;  %571 = vrot.lane.b32.xlu0 %v2628_v9, %s2406_s29  ;;  %s2094_s29 = sshll.u32 %s2511_s17, 6  ;;  %s2414_s17 = smov [#allocation6]  }
 0x193   : > { %v2636_v20 = vpop.permute.xlu1 %573  ;;  %v2638_v21 = vpop.permute.xlu0 %569 }
 0x194   : > { %v963_v22 = vrot.slane %v2636_v20, %v2634_v19  ;;  %v955_v24 = vrot.slane %v2638_v21, %v2634_v19  ;;  %577 = vrot.lane.b32.xlu0 %v2638_v21, %s2405_s18 }
 0x196   : > { %v964_v25 = vcombine.low %v955_v24, %v963_v22  ;;  %v965_v26 = vcombine.high %v955_v24, %v963_v22 }
 0x197   : > { %v2647_v27 = vpop.permute.xlu0 %571  ;;  %v576_v18 = vpop.permute.xlu1 %575 }
 0x198   : > { %v972_v28 = vrot.slane %v964_v25, %v2642_v23  ;;  %v929_v29 = vrot.slane %v2647_v27, %v2634_v19  ;;  %581 = vrot.lane.b32.xlu0 %v2636_v20, %s2405_s18  ;;  %579 = vrot.lane.b32.xlu1 %v2647_v27, %s2405_s18  ;;  %v979_v31 = vrot.slane %v965_v26, %v2642_v23 }
 0x19a   : > { %v930_v32 = vcombine.low %v921_v30, %v929_v29  ;;  %v931_v33 = vcombine.high %v921_v30, %v929_v29  ;;  %v980_v35 = vcombine.high %v972_v28, %v2409_v34  ;;  %v981_v38 = vcombine.high %v979_v31, %v2409_v34 }
 0x19b   : > { %v987_v39 = vshrl.u32 %v972_v28, 16  ;;  %v1003_v45 = vshrl.u32 %v979_v31, 16 }
 0x19c   : > { %v938_v36 = vrot.slane %v930_v32, %v2642_v23  ;;  %v945_v37 = vrot.slane %v931_v33, %v2642_v23  ;;  %v995_v44 = vshrl.u32 %v980_v35, 16  ;;  %v1011_v52 = vshrl.u32 %v981_v38, 16 }
 0x19e   : > { %v946_v40 = vcombine.high %v938_v36, %v2409_v34  ;;  %v947_v41 = vcombine.high %v945_v37, %v2409_v34  ;;  %v984_v42 = vpack.i.b16 %v972_v28, %v938_v36  ;;  %v986_v43 = vshrl.u32 %v938_v36, 16 }
 0x19f   : > { %v1000_v46 = vpack.i.b16 %v979_v31, %v945_v37  ;;  %v1002_v47 = vshrl.u32 %v945_v37, 16  ;;  %v590_v28 = vrot.slane %v576_v18, %v2634_v19 }
 0x1a0   : > { %v988_v48 = vpack.i.b16 %v987_v39, %v986_v43  ;;  %v992_v49 = vpack.i.b16 %v980_v35, %v946_v40  ;;  %v994_v50 = vshrl.u32 %v946_v40, 16  ;;  %v1008_v51 = vpack.i.b16 %v981_v38, %v947_v41 }
 0x1a1   : > { %v1004_v53 = vpack.i.b16 %v1003_v45, %v1002_v47  ;;  %v1010_v54 = vshrl.u32 %v947_v41, 16  ;;  %v1014_v55 = vcombine.low %v984_v42, %v1000_v46 }
 0x1a2   : > { %v996_v56 = vpack.i.b16 %v995_v44, %v994_v50  ;;  %v1022_v57 = vcombine.low %v992_v49, %v1008_v51 }
 0x1a3   : > { %v1012_v58 = vpack.i.b16 %v1011_v52, %v1010_v54  ;;  %v1039_v59 = vcombine.low %v988_v48, %v1004_v53  ;;  %v1021_v60 = vrot.slane %v1014_v55, %v2634_v19 }
 0x1a4   : > { %v1029_v61 = vrot.slane %v1022_v57, %v2634_v19 }
 0x1a5   : > { %v1047_v62 = vcombine.low %v996_v56, %v1012_v58  ;;  %v1046_v1 = vrot.slane %v1039_v59, %v2634_v19 }
 0x1a6   : > { %v1030_v63 = vcombine.low %v1021_v60, %v1029_v61 }
 0x1a7   : > { %v1054_v2 = vrot.slane %v1047_v62, %v2634_v19 }
 0x1a8   : > { %v1037_v3 = vrot.slane %v1030_v63, %v2642_v23 }
 0x1a9   : > { %v1055_v4 = vcombine.low %v1046_v1, %v1054_v2 }
 0x1aa   : > { %v1038_v5 = vcombine.high %v1037_v3, %v2409_v34  ;;  %v1068_v10 = vshrl.u32 %v1037_v3, 16 }
 0x1ab   : > { %v1062_v6 = vrot.slane %v1055_v4, %v2642_v23 }
 0x1ac   : > { %v1076_v14 = vshrl.u32 %v1038_v5, 16 }
 0x1ad   : > { %v1063_v7 = vcombine.high %v1062_v6, %v2409_v34  ;;  %v1066_v8 = vpack.i.b16 %v1062_v6, %v1037_v3  ;;  %v1069_v11 = vshrl.u32 %v1062_v6, 16 }
 0x1af   : > { %v1070_v12 = vpack.i.b16 %v1069_v11, %v1068_v10  ;;  %v1074_v13 = vpack.i.b16 %v1063_v7, %v1038_v5  ;;  %v1077_v15 = vshrl.u32 %v1063_v7, 16  ;;  %1081 = vst.msk [vmem:[#allocation2] sm:$0xf] %vm1080_vm2, %v1066_v8 }
 0x1b1   : > { %v1078_v16 = vpack.i.b16 %v1077_v15, %v1076_v14  ;;  %1082 = vst.msk [vmem:[#allocation2 + $0x4] sm:$0xf] %vm1080_vm2, %v1070_v12  ;;  %1083 = vst.msk [vmem:[#allocation2 + $0x8] sm:$0xf] %vm1080_vm2, %v1074_v13 }
 0x1b3   : > { %1084 = vst.msk [vmem:[#allocation2 + $0xc] sm:$0xf] %vm1080_vm2, %v1078_v16 }
 0x206   : > { %v578_v17 = vpop.permute.xlu0 %577 }
 0x207   : > { %v624_v24 = vrot.slane %v578_v17, %v2634_v19 }
 0x20a   : > { %v582_v22 = vpop.permute.xlu0 %581  ;;  %v580_v25 = vpop.permute.xlu1 %579 }
 0x20b   : > { %v632_v26 = vrot.slane %v582_v22, %v2634_v19  ;;  %v598_v29 = vrot.slane %v580_v25, %v2634_v19  ;;  %v1085_v25 = vld [vmem:[#allocation2] sm:$0xf] }
 0x20d   : > { %v633_v30 = vcombine.low %v624_v24, %v632_v26  ;;  %v634_v31 = vcombine.high %v624_v24, %v632_v26  ;;  %v599_v32 = vcombine.low %v590_v28, %v598_v29  ;;  %v600_v33 = vcombine.high %v590_v28, %v598_v29  ;;  %v1086_v28 = vld [vmem:[#allocation2 + $0x4] sm:$0xf] }
 0x20f   : > { %v641_v35 = vrot.slane %v633_v30, %v2642_v23  ;;  %v648_v36 = vrot.slane %v634_v31, %v2642_v23  ;;  %v607_v37 = vrot.slane %v599_v32, %v2642_v23  ;;  %v614_v38 = vrot.slane %v600_v33, %v2642_v23  ;;  %v1087_v30 = vld [vmem:[#allocation2 + $0x8] sm:$0xf]  ;;  %v1088_v31 = vld [vmem:[#allocation2 + $0xc] sm:$0xf]  ;;  %v2064_v32 = vld [vmem:[%s496_s27] ss:$0 sm:$0xff] }
 0x211   : > { %v649_v39 = vcombine.high %v641_v35, %v2409_v34  ;;  %v650_v40 = vcombine.high %v648_v36, %v2409_v34  ;;  %v656_v41 = vshrl.u32 %v641_v35, 16  ;;  %v672_v42 = vshrl.u32 %v648_v36, 16 }
 0x212   : > { %v615_v43 = vcombine.high %v607_v37, %v2409_v34  ;;  %v616_v44 = vcombine.high %v614_v38, %v2409_v34  ;;  %v655_v45 = vshrl.u32 %v607_v37, 16  ;;  %v671_v46 = vshrl.u32 %v614_v38, 16 }
 0x213   : > { %v653_v47 = vpack.i.b16 %v641_v35, %v607_v37  ;;  %v664_v48 = vshrl.u32 %v649_v39, 16  ;;  %v669_v49 = vpack.i.b16 %v648_v36, %v614_v38  ;;  %v680_v50 = vshrl.u32 %v650_v40, 16 }
 0x214   : > { %v663_v51 = vshrl.u32 %v615_v43, 16  ;;  %v679_v52 = vshrl.u32 %v616_v44, 16  ;;  %v657_v53 = vpack.i.b16 %v656_v41, %v655_v45  ;;  %v661_v54 = vpack.i.b16 %v649_v39, %v615_v43 }
 0x215   : > { %v673_v55 = vpack.i.b16 %v672_v42, %v671_v46  ;;  %v677_v56 = vpack.i.b16 %v650_v40, %v616_v44  ;;  %v683_v57 = vcombine.low %v653_v47, %v669_v49 }
 0x216   : > { %v665_v58 = vpack.i.b16 %v664_v48, %v663_v51  ;;  %v681_v59 = vpack.i.b16 %v680_v50, %v679_v52 }
 0x217   : > { %v691_v60 = vcombine.low %v661_v54, %v677_v56  ;;  %v708_v61 = vcombine.low %v657_v53, %v673_v55  ;;  %v690_v63 = vrot.slane %v683_v57, %v2634_v19 }
 0x218   : > { %v716_v62 = vcombine.low %v665_v58, %v681_v59 }
 0x219   : > { %v698_v1 = vrot.slane %v691_v60, %v2634_v19  ;;  %v715_v2 = vrot.slane %v708_v61, %v2634_v19 }
 0x21a   : > { %v723_v3 = vrot.slane %v716_v62, %v2634_v19 }
 0x21b   : > { %v699_v4 = vcombine.low %v690_v63, %v698_v1 }
 0x21c   : > { %v724_v5 = vcombine.low %v715_v2, %v723_v3 }
 0x21d   : > { %v706_v6 = vrot.slane %v699_v4, %v2642_v23 }
 0x21e   : > { %v731_v7 = vrot.slane %v724_v5, %v2642_v23 }
 0x21f   : > { %v736_v10 = vshrl.u32 %v706_v6, 16  ;;  %v707_v15 = vcombine.high %v706_v6, %v2409_v34 }
 0x220   : > { %v735_v8 = vpack.i.b16 %v731_v7, %v706_v6  ;;  %v737_v11 = vshrl.u32 %v731_v7, 16  ;;  %v732_v12 = vcombine.high %v731_v7, %v2409_v34 }
 0x221   : > { %v742_v22 = vshrl.u32 %v707_v15, 16 }
 0x222   : > { %v1100_v13 = vsel %vm1095_vm3, %v735_v8, 0  ;;  %v738_v14 = vpack.i.b16 %v737_v11, %v736_v10  ;;  %v743_v17 = vshrl.u32 %v732_v12, 16  ;;  %v741_v18 = vpack.i.b16 %v732_v12, %v707_v15 }
 0x223   : > { %2136 = vmatpush3.bf16.xpose.msra.mxu1 %v1100_v13 }
 0x224   : > { %v1146_v16 = vsel %vm1095_vm3, %v738_v14, 0  ;;  %2147 = vmatprep.subr.bf16.mxu1 %v2401_v0  ;;  %v744_v24 = vpack.i.b16 %v743_v17, %v742_v22  ;;  %v1192_v26 = vsel %vm1095_vm3, %v741_v18, 0 }
 0x225   : > { %2142 = vmatpush3.bf16.xpose.msra.mxu0 %v1146_v16 }
 0x226   : > { %2153 = vmatprep.subr.bf16.mxu0 %v2401_v0  ;;  %v1238_v29 = vsel %vm1095_vm3, %v744_v24, 0 }
 0x22a   : > { %2138 = vmatmul.mubr.msk.bf16.vlgmr.msra.gmra.mrb[0].mxu1 %vm1095_vm3, %v1085_v25 }
 0x22b   : > { %2148 = vmatpush3.bf16.xpose.msra.mxu1 %v1192_v26  ;;  %2149 = vmatprep.mubr.msk.bf16.mxu1 %vm2402_vm0, %v2401_v0 }
 0x22c   : > { %2144 = vmatmul.mubr.msk.bf16.vlgmr.msra.gmra.mrb[4].mxu0 %vm1095_vm3, %v1086_v28  ;;  %2159 = vmatprep.subr.bf16.mxu1 %v2401_v0 }
 0x22d   : > { %2154 = vmatpush3.bf16.xpose.msra.mxu0 %v1238_v29  ;;  %2155 = vmatprep.mubr.msk.bf16.mxu0 %vm2402_vm0, %v2401_v0 }
 0x22e   : > { %2165 = vmatprep.subr.bf16.mxu0 %v2401_v0 }
 0x232   : > { %2150 = vmatmul.mubr.msk.bf16.vlgmr.msra.gmra.mrb[4].mxu1 %vm1095_vm3, %v1087_v30 }
 0x233   : > { %2161 = vmatprep.mubr.msk.bf16.mxu1 %vm2402_vm0, %v2401_v0 }
 0x234   : > { %2156 = vmatmul.mubr.msk.bf16.vlgmr.msra.gmra.mrb[8].mxu0 %vm1095_vm3, %v1088_v31 }
 0x235   : > { %2167 = vmatprep.mubr.msk.bf16.mxu0 %vm2402_vm0, %v2401_v0 }
 0x2fd   : > { %v1136_v33 = vpop.f32.mrb[0].mxu1 }
 0x2fe   : > { %v1137_v35 = vadd.f32 %v2064_v32, %v1136_v33  ;;  %v2139_v36 = vpop.f32.mrb[1].mxu1 }
 0x2ff   : > { %v1139_v37 = vpop.f32.mrb[2].mxu1  ;;  %v1182_v38 = vpop.f32.mrb[4].mxu0 }
 0x300   : > { %v1183_v39 = vadd.f32 %v2064_v32, %v1182_v38  ;;  %v2140_v40 = vpop.f32.mrb[3].mxu1  ;;  %v2145_v41 = vpop.f32.mrb[5].mxu0  ;;  %v1280_v42 = vsel %vm1095_vm3, %v1137_v35, -inf }
 0x301   : > { %1281 = vmax.xlane.f32.xlu1 %v1280_v42  ;;  %v1185_v43 = vpop.f32.mrb[6].mxu0 }
 0x302   : > { %v2146_v44 = vpop.f32.mrb[7].mxu0  ;;  %v1283_v45 = vsel %vm1095_vm3, %v1183_v39, -inf }
 0x303   : > { %1284 = vmax.xlane.f32.xlu0 %v1283_v45 }
 0x305   : > { %v1228_v46 = vpop.f32.mrb[4].mxu1 }
 0x306   : > { %v1229_v47 = vadd.f32 %v2064_v32, %v1228_v46  ;;  %v2151_v48 = vpop.f32.mrb[5].mxu1 }
 0x307   : > { %v1231_v49 = vpop.f32.mrb[6].mxu1  ;;  %v1274_v50 = vpop.f32.mrb[8].mxu0 }
 0x308   : > { %v1275_v51 = vadd.f32 %v2064_v32, %v1274_v50  ;;  %v2152_v52 = vpop.f32.mrb[7].mxu1  ;;  %v2157_v53 = vpop.f32.mrb[9].mxu0  ;;  %v1286_v54 = vsel %vm1095_vm3, %v1229_v47, -inf }
 0x309   : > { %1287 = vmax.xlane.f32.xlu0 %v1286_v54  ;;  %v1277_v55 = vpop.f32.mrb[10].mxu0 }
 0x30a   : > { %v2158_v56 = vpop.f32.mrb[11].mxu0  ;;  %v1289_v57 = vsel %vm1095_vm3, %v1275_v51, -inf }
 0x30b   : > { %1290 = vmax.xlane.f32.xlu1 %v1289_v57 }
 0x31c   : > { %747 = vrot.lane.b32.xlu1 %v2638_v21, %s2410_s23 }
 0x31f   : > { %745 = vrot.lane.b32.xlu0 %v2628_v9, %s2410_s23 }
 0x38e   : > { %v1282_v58 = vpop.xlane.xlu1 %1281 }
 0x38f   : > { %v1292_v59 = vsub.f32 %v1137_v35, %v1282_v58 }
 0x390   : > { %v1285_v60 = vpop.xlane.xlu0 %1284 }
 0x391   : > { %v1296_v61 = vmul.f32 1.442695, %v1292_v59  ;;  %v1293_v62 = vsub.f32 %v1183_v39, %v1285_v60 }
 0x393   : > { %2280 = vpow2.f32 %v1296_v61  ;;  %v1298_v63 = vmul.f32 1.442695, %v1293_v62 }
 0x395   : > { %2282 = vpow2.f32 %v1298_v63 }
 0x396   : > { %v1288_v4 = vpop.xlane.xlu0 %1287 }
 0x397   : > { %v1294_v6 = vsub.f32 %v1229_v47, %v1288_v4 }
 0x398   : > { %v1291_v9 = vpop.xlane.xlu1 %1290 }
 0x399   : > { %v1295_v5 = vsub.f32 %v1275_v51, %v1291_v9  ;;  %v1300_v8 = vmul.f32 1.442695, %v1294_v6 }
 0x39b   : > { %v1302_v7 = vmul.f32 1.442695, %v1295_v5 }
 0x39c   : > { %v748_v13 = vpop.permute.xlu1 %747 }
 0x39d   : > { %v2722_v1 = vpop.eup %2280  ;;  %2284 = vpow2.f32 %v1302_v7  ;;  %v794_v17 = vrot.slane %v748_v13, %v2634_v19 }
 0x39e   : > { %v1304_v2 = vsel %vm1095_vm3, %v2722_v1, 0.0  ;;  %2286 = vpow2.f32 %v1300_v8 }
 0x39f   : > { %v2726_v3 = vpop.eup %2282  ;;  %1305 = vadd.xlane.f32.xlu0 %v1304_v2 }
 0x3a0   : > { %v1307_v21 = vsel %vm1095_vm3, %v2726_v3, 0.0 }
 0x3a1   : > { %1308 = vadd.xlane.f32.xlu1 %v1307_v21 }
 0x3a7   : > { %v2732_v10 = vpop.eup %2284 }
 0x3a8   : > { %v2734_v11 = vpop.eup %2286  ;;  %v1313_v12 = vsel %vm1095_vm3, %v2732_v10, 0.0 }
 0x3b2   : > { %749 = vrot.lane.b32.xlu1 %v2647_v27, %s2410_s23  ;;  %v1310_v27 = vsel %vm1095_vm3, %v2734_v11, 0.0 }
 0x3b5   : > { %751 = vrot.lane.b32.xlu0 %v2636_v20, %s2410_s23  ;;  %v746_v20 = vpop.permute.xlu0 %745  ;;  %s2946_s23 = sld [smem:[#allocation14_spill]] }
 0x3b6   : > { %v760_v24 = vrot.slane %v746_v20, %v2634_v19 }
 0x3bb   : > { %s2867_s0 = scalar_lea.hbm %s2946_s23, %s2094_s29 }
 0x3d4   : > { %1314 = vadd.xlane.f32.xlu0 %v1313_v12 }
 0x3d6   : > { %1311 = vadd.xlane.f32.xlu1 %v1310_v27 }
 0x42c   : > { %v1306_v14 = vpop.xlane.xlu0 %1305 }
 0x42d   : > { %2288 = vrcp.f32 %v1306_v14 }
 0x42e   : > { %v1309_v15 = vpop.xlane.xlu1 %1308 }
 0x42f   : > { %2290 = vrcp.f32 %v1309_v15 }
 0x430   : > { %v752_v16 = vpop.permute.xlu0 %751 }
 0x431   : > { %v802_v18 = vrot.slane %v752_v16, %v2634_v19 }
 0x432   : > { %v750_v22 = vpop.permute.xlu1 %749 }
 0x433   : > { %v803_v25 = vcombine.low %v794_v17, %v802_v18  ;;  %v804_v26 = vcombine.high %v794_v17, %v802_v18  ;;  %v768_v28 = vrot.slane %v750_v22, %v2634_v19 }
 0x435   : > { %v811_v29 = vrot.slane %v803_v25, %v2642_v23  ;;  %v818_v30 = vrot.slane %v804_v26, %v2642_v23  ;;  %v769_v31 = vcombine.low %v760_v24, %v768_v28  ;;  %v770_v32 = vcombine.high %v760_v24, %v768_v28 }
 0x437   : > { %v819_v33 = vcombine.high %v811_v29, %v2409_v34  ;;  %v820_v35 = vcombine.high %v818_v30, %v2409_v34  ;;  %v777_v36 = vrot.slane %v769_v31, %v2642_v23  ;;  %v784_v37 = vrot.slane %v770_v32, %v2642_v23  ;;  %v2289_v62 = vpop.eup %2288 }
 0x438   : > { %v826_v38 = vshrl.u32 %v811_v29, 16  ;;  %v842_v39 = vshrl.u32 %v818_v30, 16  ;;  %v1320_v8 = vmul.f32 %v2289_v62, %v2722_v1 }
 0x439   : > { %v834_v40 = vshrl.u32 %v819_v33, 16  ;;  %v785_v41 = vcombine.high %v777_v36, %v2409_v34  ;;  %v786_v42 = vcombine.high %v784_v37, %v2409_v34  ;;  %v823_v43 = vpack.i.b16 %v811_v29, %v777_v36  ;;  %v2291_v9 = vpop.eup %2290 }
 0x43a   : > { %v850_v44 = vshrl.u32 %v820_v35, 16  ;;  %v825_v45 = vshrl.u32 %v777_v36, 16  ;;  %v839_v46 = vpack.i.b16 %v818_v30, %v784_v37  ;;  %v841_v47 = vshrl.u32 %v784_v37, 16 }
 0x43b   : > { %v831_v48 = vpack.i.b16 %v819_v33, %v785_v41  ;;  %v833_v49 = vshrl.u32 %v785_v41, 16  ;;  %v847_v50 = vpack.i.b16 %v820_v35, %v786_v42  ;;  %v849_v51 = vshrl.u32 %v786_v42, 16 }
 0x43c   : > { %v827_v52 = vpack.i.b16 %v826_v38, %v825_v45  ;;  %v843_v53 = vpack.i.b16 %v842_v39, %v841_v47  ;;  %v853_v54 = vcombine.low %v823_v43, %v839_v46  ;;  %v1321_v14 = vmul.f32 %v2291_v9, %v2726_v3 }
 0x43d   : > { %v835_v55 = vpack.i.b16 %v834_v40, %v833_v49  ;;  %v851_v56 = vpack.i.b16 %v850_v44, %v849_v51  ;;  %v861_v57 = vcombine.low %v831_v48, %v847_v50  ;;  %v1324_v25 = vpack.c.bf16 %v1320_v8, %v1320_v8 }
 0x43e   : > { %v878_v58 = vcombine.low %v827_v52, %v843_v53  ;;  %v860_v59 = vrot.slane %v853_v54, %v2634_v19  ;;  %v1325_v26 = vpack.c.bf16 %v1321_v14, %v1321_v14 }
 0x43f   : > { %v886_v60 = vcombine.low %v835_v55, %v851_v56  ;;  %v868_v61 = vrot.slane %v861_v57, %v2634_v19 }
 0x440   : > { %v885_v2 = vrot.slane %v878_v58, %v2634_v19 }
 0x441   : > { %v869_v63 = vcombine.low %v860_v59, %v868_v61  ;;  %v893_v21 = vrot.slane %v886_v60, %v2634_v19 }
 0x443   : > { %v876_v4 = vrot.slane %v869_v63, %v2642_v23  ;;  %v894_v5 = vcombine.low %v885_v2, %v893_v21  ;;  %v2272_v63 = vld [vmem:[%s2915_s4] sm:$0xff]  }
 0x445   : > { %v901_v6 = vrot.slane %v894_v5, %v2642_v23  ;;  %v877_v7 = vcombine.high %v876_v4, %v2409_v34  ;;  %v906_v27 = vshrl.u32 %v876_v4, 16 }
 0x447   : > { %v905_v12 = vpack.i.b16 %v901_v6, %v876_v4  ;;  %v907_v20 = vshrl.u32 %v901_v6, 16  ;;  %v902_v13 = vcombine.high %v901_v6, %v2409_v34  ;;  %v912_v15 = vshrl.u32 %v877_v7, 16 }
 0x449   : > { %v1333_v16 = vsel %vm1331_vm4, %v905_v12, 0  ;;  %v908_v17 = vpack.i.b16 %v907_v20, %v906_v27  ;;  %v911_v18 = vpack.i.b16 %v902_v13, %v877_v7  ;;  %v913_v22 = vshrl.u32 %v902_v13, 16  ;;  %v2273_v12 = vld [vmem:[%s2915_s4 + $0x8] sm:$0xff]  }
 0x44a   : > { %2160 = vmatpush3.bf16.msra.mxu1 %v1333_v16 }
 0x44b   : > { %v1379_v24 = vsel %vm1331_vm4, %v908_v17, 0  ;;  %2171 = vmatprep.subr.bf16.mxu1 %v2401_v0  ;;  %v914_v1 = vpack.i.b16 %v913_v22, %v912_v15  ;;  %v1425_v34 = vsel %vm1331_vm4, %v911_v18, 0 }
 0x44c   : > { %2166 = vmatpush3.bf16.msra.mxu0 %v1379_v24 }
 0x44d   : > { %2162 = vmatmul.mubr.msk.bf16.vlgmr.msra.gmra.mrb[8].mxu1 %vm1095_vm3, %v1324_v25  ;;  %2177 = vmatprep.subr.bf16.mxu0 %v2401_v0  ;;  %v1471_v3 = vsel %vm1331_vm4, %v914_v1, 0 }
 0x44e   : > { %2172 = vmatpush3.bf16.msra.mxu1 %v1425_v34  ;;  %2173 = vmatprep.mubr.msk.bf16.mxu1 %vm2402_vm0, %v2401_v0 }
 0x44f   : > { %2168 = vmatmul.mubr.msk.bf16.vlgmr.msra.gmra.mrb[12].mxu0 %vm1095_vm3, %v1325_v26  ;;  %2183 = vmatprep.subr.bf16.mxu1 %v2401_v0 }
 0x450   : > { %2178 = vmatpush3.bf16.msra.mxu0 %v1471_v3  ;;  %2179 = vmatprep.mubr.msk.bf16.mxu0 %vm2402_vm0, %v2401_v0 }
 0x451   : > { %2191 = vmatprep.subr.bf16.mxu0 %v2401_v0 }
 0x461   : > { %v1315_v28 = vpop.xlane.xlu0 %1314 }
 0x462   : > { %2292 = vrcp.f32 %v1315_v28 }
 0x463   : > { %v1312_v29 = vpop.xlane.xlu1 %1311 }
 0x464   : > { %2294 = vrcp.f32 %v1312_v29 }
 0x46c   : > { %v2293_v30 = vpop.eup %2292 }
 0x46d   : > { %v1323_v31 = vmul.f32 %v2293_v30, %v2732_v10 }
 0x46e   : > { %v2295_v32 = vpop.eup %2294 }
 0x46f   : > { %v1322_v33 = vmul.f32 %v2295_v32, %v2734_v11  ;;  %v1327_v35 = vpack.c.bf16 %v1323_v31, %v1323_v31 }
 0x471   : > { %2180 = vmatmul.mubr.msk.bf16.vlgmr.msra.gmra.mrb[16].mxu0 %vm1095_vm3, %v1327_v35  ;;  %v1326_v36 = vpack.c.bf16 %v1322_v33, %v1322_v33  ;;  %v1733_v35 = vld [vmem:[%s2601_s14] sm:$0xf]  ;;  %s1960_s14 = scalar_lea.sflag [#allocation5], %s2595_s28 }
 0x472   : > { %2195 = vmatprep.mubr.msk.bf16.mxu0 %vm2402_vm0, %v2401_v0 }
 0x473   : > { %2174 = vmatmul.mubr.msk.bf16.vlgmr.msra.gmra.mrb[12].mxu1 %vm1095_vm3, %v1326_v36  ;;  %v2075_v36 = vld [vmem:[%s2916_s5] ss:$0 sm:$0xff] }
 0x474   : > { %2187 = vmatprep.mubr.msk.bf16.mxu1 %vm2402_vm0, %v2401_v0  ;;  %2184 = vmatpush3.bf16.msra.mxu1 %v2272_v63  ;;  %v2279_v63 = vld [vmem:[%s2921_s10 + $0x18] sm:$0xff]  }
 0x475   : > { %2185 = vmatprep.subr.bf16.mxu1 %v2401_v0 }
 0x478   : > { %2186 = vmatpush3.bf16.msra.mxu1 %v2273_v12 }
 0x479   : > { %2199 = vmatprep.subr.bf16.mxu1 %v2401_v0 }
 0x520   : > { %v1369_v37 = vpop.f32.mrb[8].mxu1 }
 0x521   : > { %v2163_v38 = vpop.f32.mrb[9].mxu1 }
 0x522   : > { %v1372_v39 = vpop.f32.mrb[10].mxu1  ;;  %v1415_v40 = vpop.f32.mrb[12].mxu0 }
 0x523   : > { %v2164_v10 = vpop.f32.mrb[11].mxu1  ;;  %v2169_v41 = vpop.f32.mrb[13].mxu0 }
 0x524   : > { %v1418_v42 = vpop.f32.mrb[14].mxu0 }
 0x525   : > { %v2170_v11 = vpop.f32.mrb[15].mxu0 }
 0x544   : > { %v1507_v43 = vpop.f32.mrb[16].mxu0 }
 0x545   : > { %v1529_v44 = vcombine.low %v1415_v40, %v1507_v43  ;;  %v1530_v45 = vcombine.high %v1415_v40, %v1507_v43  ;;  %v2181_v46 = vpop.f32.mrb[17].mxu0 }
 0x546   : > { %v1461_v47 = vpop.f32.mrb[12].mxu1  ;;  %v1510_v48 = vpop.f32.mrb[18].mxu0 }
 0x547   : > { %v1513_v49 = vcombine.low %v1369_v37, %v1461_v47  ;;  %v1514_v50 = vcombine.high %v1369_v37, %v1461_v47  ;;  %v2175_v51 = vpop.f32.mrb[13].mxu1  ;;  %v2182_v52 = vpop.f32.mrb[19].mxu0  ;;  %v1537_v54 = vrot.slane %v1529_v44, %v2634_v19  ;;  %v1544_v55 = vrot.slane %v1530_v45, %v2634_v19  ;;  %v2274_v48 = vld [vmem:[%s2919_s8] sm:$0xff]  }
 0x548   : > { %v1464_v53 = vpop.f32.mrb[14].mxu1  ;;  %v1734_v37 = vunpack.c.l.bf16 %v1733_v35  ;;  %2192 = vmatpush3.bf16.msra.mxu0 %v2274_v48  ;;  %v2091_v35 = vld [vmem:[%s2923_s12] ss:$0 sm:$0xff] }
 0x549   : > { %v1521_v56 = vrot.slane %v1513_v49, %v2634_v19  ;;  %v1528_v57 = vrot.slane %v1514_v50, %v2634_v19  ;;  %v2176_v58 = vpop.f32.mrb[15].mxu1  ;;  %v2275_v49 = vld [vmem:[%s2919_s8 + $0x8] sm:$0xff]   ;;  %2193 = vmatprep.subr.bf16.mxu0 %v2401_v0 }
 0x54b   : > { %v1545_v59 = vcombine.low %v1521_v56, %v1537_v54  ;;  %v1546_v60 = vcombine.high %v1521_v56, %v1537_v54  ;;  %v1561_v61 = vcombine.low %v1528_v57, %v1544_v55  ;;  %v1562_v62 = vcombine.high %v1528_v57, %v1544_v55  ;;  %v2079_v54 = vld [vmem:[%s2917_s6] ss:$0 sm:$0xff] }
 0x54c   : > { %2194 = vmatpush3.bf16.msra.mxu0 %v2275_v49  ;;  %v2080_v56 = vld [vmem:[%s2918_s7] ss:$0 sm:$0xff] }
 0x54d   : > { %v1553_v2 = vrot.slane %v1545_v59, %v2642_v23  ;;  %v1560_v21 = vrot.slane %v1546_v60, %v2642_v23  ;;  %v1569_v9 = vrot.slane %v1561_v61, %v2642_v23  ;;  %v1576_v4 = vrot.slane %v1562_v62, %v2642_v23  ;;  %v2276_v60 = vld [vmem:[%s2921_s10] sm:$0xff]   ;;  %v2277_v61 = vld [vmem:[%s2921_s10 + $0x8] sm:$0xff]   ;;  %v2278_v62 = vld [vmem:[%s2921_s10 + $0x10] sm:$0xff]  }
 0x54f   : > { %v1581_v5 = vcombine.low %v1553_v2, %v1560_v21  ;;  %v2073_v6 = vcombine.high %v1553_v2, %v1560_v21  ;;  %v1597_v7 = vcombine.low %v1569_v9, %v1576_v4  ;;  %v2074_v8 = vcombine.high %v1569_v9, %v1576_v4  ;;  %v2081_v2 = vld [vmem:[%s2920_s9] ss:$0 sm:$0xff] }
 0x551   : > { %v1588_v27 = vrot.slane %v1581_v5, %v2634_v19  ;;  %v1596_v20 = vrot.slane %v2073_v6, %v2634_v19  ;;  %v1604_v13 = vrot.slane %v1597_v7, %v2634_v19  ;;  %v1612_v14 = vrot.slane %v2074_v8, %v2634_v19 }
 0x553   : > { %v1614_v15 = vcombine.high %v1588_v27, %v1596_v20  ;;  %v1630_v16 = vcombine.high %v1604_v13, %v1612_v14  ;;  %v1613_v17 = vcombine.low %v1588_v27, %v1596_v20  ;;  %v1629_v18 = vcombine.low %v1604_v13, %v1612_v14 }
 0x555   : > { %v1628_v22 = vrot.slane %v1614_v15, %v2642_v23  ;;  %v1644_v24 = vrot.slane %v1630_v16, %v2642_v23  ;;  %v1621_v25 = vrot.slane %v1613_v17, %v2642_v23  ;;  %v1637_v1 = vrot.slane %v1629_v18, %v2642_v23  ;;  %v2085_v17 = vld [vmem:[%s2922_s11] ss:$0 sm:$0xff] }
 0x557   : > { %v1647_v34 = vcombine.low %v1628_v22, %v1644_v24  ;;  %v1646_v26 = vcombine.high %v1621_v25, %v1637_v1  ;;  %v1648_v3 = vcombine.high %v1628_v22, %v1644_v24  ;;  %v1645_v28 = vcombine.low %v1621_v25, %v1637_v1 }
 0x559   : > { %1654 = vrot.lane.b32.xlu1 %v1647_v34, %s2411_s19  ;;  %1650 = vrot.lane.b32.xlu0 %v1646_v26, %s2412_s24  ;;  %s493_s19 = scalar_lea.vmem [#allocation6], %s2058_s21  ;;  %s2336_s21 = sshll.u32 %s2414_s17, 4  ;;  %s2337_s21 = int_to_ptr.vmem [resolvable:$false] %s2336_s21 }
 0x55a   : > { %s1973_s24 = sshll.u32 %s493_s19, 4  ;;  %s2338_s15 = scalar_lea.vmem %s2337_s21, 128  ;;  %s2869_s24 = int_to_ptr.vmem [resolvable:$true] %s1973_s24 }
 0x55b   : > { %s2332_s20 = scalar_lea.vmem %s2869_s24, 64  ;;  %p2339_p10 = scmp.lt.s32.totalorder %s2869_s24, %s2337_s21 }
 0x55c   : > { %p2333_p11 = scmp.ne.s32.totalorder %s2869_s24, %s2332_s20  ;;  %p2340_p2 = scmp.lt.s32.totalorder %s2338_s15, %s2332_s20 }
 0x55d   : > { %1658 = vrot.lane.b32.xlu1 %v1648_v3, %s2413_s22 }
 0x55e   : > { %p2334_p13 = pnand %p2333_p11, %p2947_p12  ;;  %p2341_p4 = por %p2340_p2, %p2339_p10 }
 0x560   : > { %p2335_p7 = pneg %p2334_p13 }
 0x562   : > { %p2342_p5 = pnand %p2341_p4, %p2335_p7 }
 0x5cb   : > { %v1655_v19 = vpop.permute.xlu1 %1654  ;;  %v1651_v29 = vpop.permute.xlu0 %1650 }
 0x5cc   : > { %v1661_v30 = vsel %vm1095_vm3, %v1645_v28, %v1651_v29 }
 0x5cd   : > { %v1663_v32 = vsel %vm1662_vm5, %v1661_v30, %v1655_v19 }
 0x5cf   : > { %v1659_v31 = vpop.permute.xlu1 %1658 }
 0x5d0   : > { %v1665_v23 = vsel %vm1664_vm6, %v1663_v32, %v1659_v31 }
 0x5d1   : > { %v1666_v33 = vpack.c.bf16 %v1665_v23, %v1665_v23 }
 0x5d3   : > { %2188 = vmatmul.mubr.msk.bf16.vlgmr.msra.gmra.mrb[16].mxu1 %vm523_vm1, %v1666_v33 }
 0x5d4   : > { %2207 = vmatprep.mubr.msk.bf16.mxu1 %vm2402_vm0, %v2401_v0  ;;  %2200 = vmatpush3.bf16.msra.mxu1 %v2276_v60 }
 0x5d5   : > { %2201 = vmatprep.subr.bf16.mxu1 %v2401_v0 }
 0x5d8   : > { %2202 = vmatpush3.bf16.msra.mxu1 %v2277_v61 }
 0x5d9   : > { %2203 = vmatprep.subr.bf16.mxu1 %v2401_v0 }
 0x5dc   : > { %2204 = vmatpush3.bf16.msra.mxu1 %v2278_v62 }
 0x5dd   : > { %2205 = vmatprep.subr.bf16.mxu1 %v2401_v0 }
 0x5e0   : > { %2206 = vmatpush3.bf16.msra.mxu1 %v2279_v63 }
 0x6a6   : > { %v1727_v38 = vpop.f32.mrb[16].mxu1 }
 0x6a7   : > { %v1728_v39 = vadd.f32 %v2075_v36, %v1727_v38  ;;  %v2189_v40 = vpop.f32.mrb[17].mxu1 }
 0x6a8   : > { %v1730_v10 = vpop.f32.mrb[18].mxu1 }
 0x6a9   : > { %v2190_v41 = vpop.f32.mrb[19].mxu1  ;;  %v1735_v42 = vadd.f32 %v1734_v37, %v1728_v39  ;;  %v2092_v37 = vld [vmem:[%s2924_s13] ss:$0 sm:$0xff] }
 0x6ab   : > { %v1738_v11 = vsel %vm523_vm1, %v1735_v42, 0.0 }
 0x6ac   : > { %1739 = vadd.xlane.f32.xlu0 %v1738_v11 }
 0x739   : > { %v1740_v43 = vpop.xlane.xlu0 %1739 }
 0x73a   : > { %v1742_v44 = vmul.f32 0.03125, %v1740_v43 }
 0x73c   : > { %v1743_v45 = vsub.f32 %v1735_v42, %v1742_v44 }
 0x73e   : > { %v1744_v46 = vmul.f32 %v1743_v45, %v1743_v45 }
 0x740   : > { %v1745_v47 = vsel %vm523_vm1, %v1744_v46, 0.0 }
 0x741   : > { %1746 = vadd.xlane.f32.xlu1 %v1745_v47 }
 0x7ce   : > { %v1747_v50 = vpop.xlane.xlu1 %1746 }
 0x7cf   : > { %v1748_v51 = vmul.f32 0.03125, %v1747_v50 }
 0x7d1   : > { %v1749_v52 = vadd.f32 1e-12, %v1748_v51 }
 0x7d3   : > { %2296 = vrsqrt.f32 %v1749_v52 }
 0x7dd   : > { %v2297_v53 = vpop.eup %2296 }
 0x7de   : > { %v1751_v55 = vmul.f32 %v2297_v53, %v1743_v45 }
 0x7e0   : > { %v1758_v57 = vmul.f32 %v2079_v54, %v1751_v55 }
 0x7e2   : > { %v1765_v58 = vadd.f32 %v2080_v56, %v1758_v57 }
 0x7e4   : > { %v1766_v59 = vpack.c.bf16 %v1765_v58, %v1765_v58 }
 0x7e6   : > { %2196 = vmatmul.mubr.msk.bf16.vlgmr.msra.gmra.mrb[20].mxu0 %vm523_vm1, %v1766_v59 }
 0x8b9   : > { %v1827_v21 = vpop.f32.mrb[20].mxu0 }
 0x8ba   : > { %v1828_v9 = vadd.f32 %v2081_v2, %v1827_v21  ;;  %v2197_v4 = vpop.f32.mrb[21].mxu0 }
 0x8bb   : > { %v1830_v5 = vpop.f32.mrb[22].mxu0 }
 0x8bc   : > { %v1834_v6 = vmul.f32 %v1828_v9, %v1828_v9  ;;  %v2198_v7 = vpop.f32.mrb[23].mxu0  ;;  %v1833_v13 = vmul.f32 0.5, %v1828_v9 }
 0x8be   : > { %v1835_v8 = vmul.f32 %v1834_v6, %v1828_v9 }
 0x8c0   : > { %v1836_v12 = vmul.f32 0.044715, %v1835_v8 }
 0x8c2   : > { %v1837_v27 = vadd.f32 %v1836_v12, %v1828_v9 }
 0x8c4   : > { %v1838_v20 = vmul.f32 0.7978846, %v1837_v27 }
 0x8c6   : > { %2298 = vtanh.f32 %v1838_v20 }
 0x8d0   : > { %v2299_v0 = vpop.eup %2298 }
 0x8d1   : > { %v1840_v14 = vadd.f32 1.0, %v2299_v0 }
 0x8d3   : > { %v1841_v15 = vmul.f32 %v1840_v14, %v1833_v13 }
 0x8d5   : > { %v1842_v16 = vpack.c.bf16 %v1841_v15, %v1841_v15 }
 0x8d7   : > { %2208 = vmatmul.mubr.msk.bf16.vlgmr.msra.gmra.mrb[20].mxu1 %vm1882_vm7, %v1842_v16 }
 0x9aa   : > { %v1920_v18 = vpop.f32.mrb[20].mxu1 }
 0x9ab   : > { %v1921_v22 = vadd.f32 %v2085_v17, %v1920_v18  ;;  %v2209_v24 = vpop.f32.mrb[21].mxu1 }
 0x9ac   : > { %v1923_v25 = vpop.f32.mrb[22].mxu1 }
 0x9ad   : > { %v2210_v1 = vpop.f32.mrb[23].mxu1  ;;  %v1926_v34 = vadd.f32 %v1921_v22, %v1765_v58 }
 0x9af   : > { %v1929_v26 = vsel %vm523_vm1, %v1926_v34, 0.0 }
 0x9b0   : > { %1930 = vadd.xlane.f32.xlu0 %v1929_v26 }
 0xa3d   : > { %v1931_v3 = vpop.xlane.xlu0 %1930 }
 0xa3e   : > { %v1932_v28 = vmul.f32 0.03125, %v1931_v3 }
 0xa40   : > { %v1933_v19 = vsub.f32 %v1926_v34, %v1932_v28 }
 0xa42   : > { %v1934_v29 = vmul.f32 %v1933_v19, %v1933_v19 }
 0xa44   : > { %v1935_v30 = vsel %vm523_vm1, %v1934_v29, 0.0 }
 0xa45   : > { %1936 = vadd.xlane.f32.xlu0 %v1935_v30 }
 0xad2   : > { %v1937_v31 = vpop.xlane.xlu0 %1936 }
 0xad3   : > { %v1938_v32 = vmul.f32 0.03125, %v1937_v31 }
 0xad5   : > { %v1939_v23 = vadd.f32 1e-12, %v1938_v32 }
 0xad7   : > { %2300 = vrsqrt.f32 %v1939_v23 }
 0xae1   : > { %v2301_v33 = vpop.eup %2300 }
 0xae2   : > { %v1941_v36 = vmul.f32 %v2301_v33, %v1933_v19 }
 0xae4   : > { %v1948_v38 = vmul.f32 %v2091_v35, %v1941_v36 }
 0xae6   : > { %v1955_v39 = vadd.f32 %v2092_v37, %v1948_v38 }
 0xae8   : > { %v1956_v40 = vpack.c.bf16 %v1955_v39, %v1955_v39 }
 0xaea   : > { %1958 = vst.msk [vmem:[%s493_s19] sm:$0xf] %vm1957_vm8, %v1956_v40 }
 0xaeb   : > { %2345 = shalt.err (!%p2342_p5)
}
 0xaec   : > { %s2346_s28 = scalar_lea.hbm %s2867_s0, 64  ;;  %s2350_s19 = scalar_lea.hbm %s2946_s23, 128 }
 0xaed   : > { %p2347_p8 = scmp.ne.s32.totalorder %s2867_s0, %s2346_s28  ;;  %p2351_p1 = scmp.lt.u32.totalorder %s2867_s0, %s2946_s23 }
 0xaee   : > { %p2352_p3 = scmp.lt.u32.totalorder %s2350_s19, %s2346_s28  ;;  %p2354_p11 = scmp.lt.u32.totalorder %s2346_s28, %s2867_s0 }
 0xaef   : > { %p2348_p9 = pnand %p2347_p8, %p2947_p12 }
 0xaf0   : > { %p2353_p6 = por %p2352_p3, %p2351_p1 }
 0xaf1   : > { %p2349_p0 = pneg %p2348_p9 }
 0xaf2   : > { %p2355_p13 = por %p2354_p11, %p2353_p6 }
 0xaf4   : > { %p2356_p7 = pnand %p2355_p13, %p2349_p0 }
 0xaf6   : > { %2359 = shalt.err (!%p2356_p7)
}
 0xaf7   : > { %2213 = dma.vmem_to_hbm [thread:$0]  (%p2947_p12), %s2869_s24, 64, %s2867_s0, %s1960_s14  }
 0xaf8 PF: > { %s2948_s20 = sld [smem:[#allocation9_spill]]  ;;  %p2949_p10 = scmp.ne.s32.totalorder %s2941_s26, 0 }
 0xaf9   : > { %p2950_p2 = scmp.ge.s32.totalorder %s2398_s16, 2 }
 0xafb   : > { %p2220_p4 = pnand %p2950_p2, %p2949_p10 }
 0xafe   : > { %s1985_s17 = sand.u32 1, %s2948_s20  }
 0xaff   : > { %s1986_s21 = scalar_lea.sflag [#allocation5], %s1985_s17 }
 0xb00   : > { %2381 = dma.done.wait (!%p2220_p4), %s1986_s21, 64  }
 0xb01   : > { %2383 = vsyncadd (!%p2220_p4), %s1986_s21, 4294967232  ;;  %s2951_s16 = sld [smem:[#allocation11_spill]]  ;;  %s2952_s15 = sld [smem:[#allocation10_spill]] }
 0xb02   : > { %s2953_s28 = sld [smem:[#allocation12_spill]]  ;;  %s2954_s29 = smov %s2390_s30 }
 0xb07   : > { %p27_p5 = scmp.ge.s32.totalorder %s2951_s16, 4   ;;  %s2955_s30 = smov %s2952_s15 }
 0xb08   : > { %s2956_s15 = smov %s2953_s28 }
 0xb09   :  { %29 = sbr.rel (!%p27_p5) target bundleno = 8 (0x8), region = 124 }
 0xb10   :  { %1991 = vsyncpa [#allocation4], 1 }
 0xb11   :  { %1993 = vsyncpa [#allocation4 + $0x1], 1 }
 0xb12   :  { %1994 = vsyncpa [#allocation5], 1 }
 0xb13   :  { %1996 = vsyncpa [#allocation5 + $0x1], 1 }

</bundles_post_ra>
